<compile_context>
chip_gen: v7x
topology: tpu7x:2x2x1
jax: 0.10.0
libtpu: 0.0.40
codegen_flags: <defaults>
</compile_context>

<pallas_src>
import jax
import jax.numpy as jnp
from jax import lax
import numpy as np
from jax.experimental import pallas as pl
from jax.experimental.pallas import tpu as pltpu

# ----------------------------- model hyper-params (small) -----------------------------
VOCAB = 50
EMB = 32       # embedding_dim
HID = 32       # hidden_dim
CLS = 4        # num_classes
BATCH = 2
SEQ = 8

LANE = 128                                     # TPU lane width
VPAD = ((VOCAB + LANE - 1) // LANE) * LANE     # vocab padded to full lanes (128)
EPAD = ((EMB + LANE - 1) // LANE) * LANE       # embedding dim padded to full lanes (128)


# ----------------------------------- Pallas kernel ------------------------------------
def make_textrnn_kernel(S, BP):
    """S: sequence length, BP: (sublane-padded) batch rows inside the kernel."""

    def kernel(ids_ref,        # [S*BP, 1] int32, time-major rows (row = t*BP + b)
               emb_ref,        # [VPAD, EPAD] f32 embedding table (zero-padded)
               wih_f_ref,      # [EPAD, 4H]   (zero rows beyond EMB)
               whh_f_ref,      # [H, 4H]
               b_f_ref,        # [1, 4H]      (b_ih + b_hh, forward)
               wih_b_ref,      # [EPAD, 4H]
               b_b_ref,        # [1, 4H]      (b_ih + b_hh, backward)
               fc_w_ref,       # [2H, LANE]   lane-padded fc weight (concat order: fwd|bwd)
               fc_b_ref,       # [1, LANE]
               out_ref,        # [BP, LANE]
               gates_scratch): # VMEM [S*BP, 4H] f32
        V = emb_ref.shape[0]
        H = whh_f_ref.shape[0]
        SB = S * BP

        # ---- embedding gather fused in-kernel: one-hot @ table (MXU, 128-lane dense) ----
        ids = ids_ref[...]                                        # [SB, 1]
        vocab_iota = lax.broadcasted_iota(jnp.int32, (SB, V), 1)
        onehot = (vocab_iota == ids).astype(jnp.float32)          # [SB, VPAD]
        x_emb = jnp.dot(onehot, emb_ref[...],
                        preferred_element_type=jnp.float32)       # [SB, EPAD]

        # ---- input projection hoisted out of the recurrence: ONE matmul for all t ----
        gates_scratch[...] = (jnp.dot(x_emb, wih_f_ref[...],
                                      preferred_element_type=jnp.float32)
                              + b_f_ref[...])                     # [SB, 4H]

        def gate_combine(gates, c_prev):
            # full-width activations over all 4H lanes (EUP), then static 32-lane slices
            sg = jax.nn.sigmoid(gates)
            tg = jnp.tanh(gates)
            i = sg[:, 0 * H:1 * H]
            f = sg[:, 1 * H:2 * H]
            g = tg[:, 2 * H:3 * H]
            o = sg[:, 3 * H:4 * H]
            c_new = f * c_prev + i * g
            h_new = o * jnp.tanh(c_new)
            return h_new, c_new

        # ---- forward recurrence: the serialized critical path ----
        whh_f = whh_f_ref[...]                                    # weight load hoisted
        h0 = jnp.zeros((BP, H), jnp.float32)
        c0 = jnp.zeros((BP, H), jnp.float32)

        def fwd_body(t, carry):
            h, c = carry
            off = pl.multiple_of(t * BP, BP)                      # sublane-aligned slice
            gates = gates_scratch[pl.ds(off, BP), :] + jnp.dot(
                h, whh_f, preferred_element_type=jnp.float32)
            return gate_combine(gates, c)

        h_fwd, _ = lax.fori_loop(0, S, fwd_body, (h0, c0), unroll=True)

        # ---- backward direction at the last position: one step from zero state ----
        # (h0 == 0  =>  h0 @ Whh_b == 0, so Whh_b drops out entirely)
        gates_b = (jnp.dot(x_emb[(S - 1) * BP:, :], wih_b_ref[...],
                           preferred_element_type=jnp.float32)
                   + b_b_ref[...])                                # [BP, 4H]
        h_bwd, _ = gate_combine(gates_b, c0)

        # ---- dropout = identity (inference); fc on concat via split matmuls (no lane
        #      concat through the XLU); full-vreg unmasked store ----
        out_ref[...] = (jnp.dot(h_fwd, fc_w_ref[0:H, :],
                                preferred_element_type=jnp.float32)
                        + jnp.dot(h_bwd, fc_w_ref[H:2 * H, :],
                                  preferred_element_type=jnp.float32)
                        + fc_b_ref[...])                          # [BP, LANE]

    return kernel


# ------------------------------------- wrappers ----------------------------------------
def prepare_params(params):
    """One-time weight re-layout: transpose to [in, out], sum biases, lane-pad everything."""
    emb_pad = jnp.zeros((VPAD, EPAD), jnp.float32).at[:VOCAB, :EMB].set(
        params["embedding"].astype(jnp.float32))
    wih_f_pad = jnp.zeros((EPAD, 4 * HID), jnp.float32).at[:EMB, :].set(params["wih_f"].T)
    wih_b_pad = jnp.zeros((EPAD, 4 * HID), jnp.float32).at[:EMB, :].set(params["wih_b"].T)
    fc_w_pad = jnp.zeros((2 * HID, LANE), jnp.float32).at[:, :CLS].set(params["fc_w"].T)
    fc_b_pad = jnp.zeros((1, LANE), jnp.float32).at[0, :CLS].set(params["fc_b"])
    return dict(
        emb=emb_pad,                                              # [VPAD, EPAD]
        wih_f=wih_f_pad,                                          # [EPAD, 4H]
        whh_f=params["whh_f"].T,                                  # [H, 4H]
        b_f=(params["bih_f"] + params["bhh_f"])[None, :],         # [1, 4H]
        wih_b=wih_b_pad,                                          # [EPAD, 4H]
        b_b=(params["bih_b"] + params["bhh_b"])[None, :],         # [1, 4H]
        fc_w=fc_w_pad,                                            # [2H, LANE]
        fc_b=fc_b_pad,                                            # [1, LANE]
    )


def textrnn_forward(x_ids, prep):
    """x_ids: int32 [B, S] token indices -> logits [B, CLS]."""
    B, S = x_ids.shape
    BP = max(8, ((B + 7) // 8) * 8)                               # sublane-dense batch

    # pad batch rows with token 0 (padding_idx -> zero embedding) and flatten time-major
    ids_pad = jnp.zeros((BP, S), jnp.int32).at[:B, :].set(x_ids.astype(jnp.int32))
    ids_tm = ids_pad.T.reshape(S * BP, 1)                         # row = t*BP + b

    kernel = make_textrnn_kernel(S, BP)
    out = pl.pallas_call(
        kernel,
        out_shape=jax.ShapeDtypeStruct((BP, LANE), jnp.float32),
        in_specs=[pl.BlockSpec(memory_space=pltpu.MemorySpace.VMEM)] * 9,
        out_specs=pl.BlockSpec(memory_space=pltpu.MemorySpace.VMEM),
        scratch_shapes=[pltpu.VMEM((S * BP, 4 * HID), jnp.float32)],
    )(ids_tm, prep["emb"],
      prep["wih_f"], prep["whh_f"], prep["b_f"],
      prep["wih_b"], prep["b_b"],
      prep["fc_w"], prep["fc_b"])

    return out[:B, :CLS]


# -------------------------------- pure-JAX reference -----------------------------------
def _lstm_scan_ref(emb, wih_t, whh_t, b, reverse):
    # emb: [B, S, E]; wih_t: [E,4H]; whh_t: [H,4H]; b: [1,4H]
    B = emb.shape[0]
    H = whh_t.shape[0]

    def cell(carry, x_t):
        h, c = carry
        gates = x_t @ wih_t + h @ whh_t + b
        i = jax.nn.sigmoid(gates[:, :H])
        f = jax.nn.sigmoid(gates[:, H:2 * H])
        g = jnp.tanh(gates[:, 2 * H:3 * H])
        o = jax.nn.sigmoid(gates[:, 3 * H:])
        c = f * c + i * g
        h = o * jnp.tanh(c)
        return (h, c), h

    xs = jnp.swapaxes(emb, 0, 1)                 # [S, B, E]
    if reverse:
        xs = xs[::-1]
    (_, _), hs = lax.scan(cell, (jnp.zeros((B, H)), jnp.zeros((B, H))), xs)
    if reverse:
        hs = hs[::-1]
    return hs                                    # [S, B, H]


def textrnn_reference(x_ids, params):
    emb = params["embedding"][x_ids].astype(jnp.float32)
    hs_f = _lstm_scan_ref(emb, params["wih_f"].T, params["whh_f"].T,
                          (params["bih_f"] + params["bhh_f"])[None, :], reverse=False)
    hs_b = _lstm_scan_ref(emb, params["wih_b"].T, params["whh_b"].T,
                          (params["bih_b"] + params["bhh_b"])[None, :], reverse=True)
    last_hidden = jnp.concatenate([hs_f[-1], hs_b[-1]], axis=-1)   # output[:, -1, :]
    return last_hidden @ params["fc_w"].T + params["fc_b"]


# ------------------------------------- params ------------------------------------------
def init_params(key):
    ks = jax.random.split(key, 11)
    scale = 0.1
    emb_tbl = scale * jax.random.normal(ks[0], (VOCAB, EMB), jnp.float32)
    emb_tbl = emb_tbl.at[0].set(0.0)             # padding_idx=0
    p = {
        "embedding": emb_tbl,
        "wih_f": scale * jax.random.normal(ks[1], (4 * HID, EMB), jnp.float32),
        "whh_f": scale * jax.random.normal(ks[2], (4 * HID, HID), jnp.float32),
        "bih_f": scale * jax.random.normal(ks[3], (4 * HID,), jnp.float32),
        "bhh_f": scale * jax.random.normal(ks[4], (4 * HID,), jnp.float32),
        "wih_b": scale * jax.random.normal(ks[5], (4 * HID, EMB), jnp.float32),
        "whh_b": scale * jax.random.normal(ks[6], (4 * HID, HID), jnp.float32),
        "bih_b": scale * jax.random.normal(ks[7], (4 * HID,), jnp.float32),
        "bhh_b": scale * jax.random.normal(ks[8], (4 * HID,), jnp.float32),
        "fc_w": scale * jax.random.normal(ks[9], (CLS, 2 * HID), jnp.float32),
        "fc_b": scale * jax.random.normal(ks[10], (CLS,), jnp.float32),
    }
    return p


# --------------------------------------- main ------------------------------------------
if __name__ == "__main__":
    key = jax.random.PRNGKey(0)
    pkey, xkey = jax.random.split(key)
    params = init_params(pkey)
    x = jax.random.randint(xkey, (BATCH, SEQ), 0, VOCAB, dtype=jnp.int32)

    prep = prepare_params(params)               # one-time weight re-layout
    fwd = jax.jit(textrnn_forward)

    logits = jax.block_until_ready(fwd(x, prep))

    ref = jax.block_until_ready(textrnn_reference(x, params))
    np.testing.assert_allclose(np.asarray(logits), np.asarray(ref), rtol=1e-4, atol=1e-4)

    print("KERNEL_OK")
</pallas_src>

<mosaic_0001>
module attributes {stable_mosaic.version = 11 : i64} {
  func.func @kernel(%arg0: memref<64x1xi32, #tpu.memory_space<vmem>>, %arg1: memref<128x128xf32, #tpu.memory_space<vmem>>, %arg2: memref<128x128xf32, #tpu.memory_space<vmem>>, %arg3: memref<32x128xf32, #tpu.memory_space<vmem>>, %arg4: memref<1x128xf32, #tpu.memory_space<vmem>>, %arg5: memref<128x128xf32, #tpu.memory_space<vmem>>, %arg6: memref<1x128xf32, #tpu.memory_space<vmem>>, %arg7: memref<64x128xf32, #tpu.memory_space<vmem>>, %arg8: memref<1x128xf32, #tpu.memory_space<vmem>>, %arg9: memref<8x128xf32, #tpu.memory_space<vmem>>, %arg10: memref<64x128xf32, #tpu.memory_space<vmem>>) attributes {dimension_semantics = [], scalar_prefetch = 0 : i64, scratch_operands = 1 : i64, tpu.core_type = #tpu.core_type<tc>} {
    %c0 = arith.constant 0 : index
    %c0_0 = arith.constant 0 : index
    %0 = vector.load %arg0[%c0, %c0_0] : memref<64x1xi32, #tpu.memory_space<vmem>>, vector<64x1xi32>
    %1 = tpu.iota {dimensions = array<i32: 1>} : vector<64x128xi32>
    %2 = vector.broadcast %0 : vector<64x1xi32> to vector<64x128xi32>
    %3 = arith.cmpi eq, %1, %2 : vector<64x128xi32>
    %4 = arith.extui %3 : vector<64x128xi1> to vector<64x128xi32>
    %5 = arith.sitofp %4 : vector<64x128xi32> to vector<64x128xf32>
    %c0_1 = arith.constant 0 : index
    %c0_2 = arith.constant 0 : index
    %6 = vector.load %arg1[%c0_1, %c0_2] : memref<128x128xf32, #tpu.memory_space<vmem>>, vector<128x128xf32>
    %cst = arith.constant dense<0.000000e+00> : vector<64x128xf32>
    %7 = tpu.matmul %5, %6, %cst {dimension_numbers = #tpu.dot_dimension_numbers<[1], [0], [0], [1], [0, 0, 1, 1], [], []>} : vector<64x128xf32>, vector<128x128xf32>, vector<64x128xf32> -> vector<64x128xf32>
    %c0_3 = arith.constant 0 : index
    %c0_4 = arith.constant 0 : index
    %8 = vector.load %arg2[%c0_3, %c0_4] : memref<128x128xf32, #tpu.memory_space<vmem>>, vector<128x128xf32>
    %cst_5 = arith.constant dense<0.000000e+00> : vector<64x128xf32>
    %9 = tpu.matmul %7, %8, %cst_5 {dimension_numbers = #tpu.dot_dimension_numbers<[1], [0], [0], [1], [0, 0, 1, 1], [], []>} : vector<64x128xf32>, vector<128x128xf32>, vector<64x128xf32> -> vector<64x128xf32>
    %c0_6 = arith.constant 0 : index
    %c0_7 = arith.constant 0 : index
    %10 = vector.load %arg4[%c0_6, %c0_7] : memref<1x128xf32, #tpu.memory_space<vmem>>, vector<1x128xf32>
    %11 = vector.broadcast %10 : vector<1x128xf32> to vector<64x128xf32>
    %12 = arith.addf %9, %11 : vector<64x128xf32>
    %c0_8 = arith.constant 0 : index
    %c0_9 = arith.constant 0 : index
    %13 = vector.load %arg10[%c0_8, %c0_9] : memref<64x128xf32, #tpu.memory_space<vmem>>, vector<64x128xf32>
    tpu.vector_store %arg10[%c0_8, %c0_9], %12 {strides = array<i32>} : memref<64x128xf32, #tpu.memory_space<vmem>>, vector<64x128xf32>,
    %c0_10 = arith.constant 0 : index
    %c0_11 = arith.constant 0 : index
    %14 = vector.load %arg3[%c0_10, %c0_11] : memref<32x128xf32, #tpu.memory_space<vmem>>, vector<32x128xf32>
    %cst_12 = arith.constant 0.000000e+00 : f32
    %15 = vector.broadcast %cst_12 : f32 to vector<8x32xf32>
    %cst_13 = arith.constant 0.000000e+00 : f32
    %16 = vector.broadcast %cst_13 : f32 to vector<8x32xf32>
    %c0_i32 = arith.constant 0 : i32
    %c8_i32 = arith.constant 8 : i32
    %17 = arith.muli %c0_i32, %c8_i32 : i32
    %18 = tpu.assume_multiple %17, 8 : i32
    %19 = arith.index_cast %18 : i32 to index
    %c0_14 = arith.constant 0 : index
    %20 = vector.load %arg10[%19, %c0_14] : memref<64x128xf32, #tpu.memory_space<vmem>>, vector<8x128xf32>
    %cst_15 = arith.constant dense<0.000000e+00> : vector<8x128xf32>
    %21 = tpu.matmul %15, %14, %cst_15 {dimension_numbers = #tpu.dot_dimension_numbers<[1], [0], [0], [1], [0, 0, 1, 1], [], []>} : vector<8x32xf32>, vector<32x128xf32>, vector<8x128xf32> -> vector<8x128xf32>
    %22 = arith.addf %20, %21 : vector<8x128xf32>
    %23 = arith.negf %22 : vector<8x128xf32>
    %24 = math.exp %23 : vector<8x128xf32>
    %cst_16 = arith.constant 1.000000e+00 : f32
    %25 = vector.broadcast %cst_16 : f32 to vector<8x128xf32>
    %26 = arith.addf %25, %24 : vector<8x128xf32>
    %27 = arith.divf %25, %26 : vector<8x128xf32>
    %28 = math.tanh %22 : vector<8x128xf32>
    %29 = vector.extract_strided_slice %27 {offsets = [0, 0], sizes = [8, 32], strides = [1, 1]} : vector<8x128xf32> to vector<8x32xf32>
    %30 = vector.extract_strided_slice %27 {offsets = [0, 32], sizes = [8, 32], strides = [1, 1]} : vector<8x128xf32> to vector<8x32xf32>
    %31 = vector.extract_strided_slice %28 {offsets = [0, 64], sizes = [8, 32], strides = [1, 1]} : vector<8x128xf32> to vector<8x32xf32>
    %32 = vector.extract_strided_slice %27 {offsets = [0, 96], sizes = [8, 32], strides = [1, 1]} : vector<8x128xf32> to vector<8x32xf32>
    %33 = arith.mulf %30, %16 : vector<8x32xf32>
    %34 = arith.mulf %29, %31 : vector<8x32xf32>
    %35 = arith.addf %33, %34 : vector<8x32xf32>
    %36 = math.tanh %35 : vector<8x32xf32>
    %37 = arith.mulf %32, %36 : vector<8x32xf32>
    %c1_i32 = arith.constant 1 : i32
    %c8_i32_17 = arith.constant 8 : i32
    %38 = arith.muli %c1_i32, %c8_i32_17 : i32
    %39 = tpu.assume_multiple %38, 8 : i32
    %40 = arith.index_cast %39 : i32 to index
    %c0_18 = arith.constant 0 : index
    %41 = vector.load %arg10[%40, %c0_18] : memref<64x128xf32, #tpu.memory_space<vmem>>, vector<8x128xf32>
    %cst_19 = arith.constant dense<0.000000e+00> : vector<8x128xf32>
    %42 = tpu.matmul %37, %14, %cst_19 {dimension_numbers = #tpu.dot_dimension_numbers<[1], [0], [0], [1], [0, 0, 1, 1], [], []>} : vector<8x32xf32>, vector<32x128xf32>, vector<8x128xf32> -> vector<8x128xf32>
    %43 = arith.addf %41, %42 : vector<8x128xf32>
    %44 = arith.negf %43 : vector<8x128xf32>
    %45 = math.exp %44 : vector<8x128xf32>
    %cst_20 = arith.constant 1.000000e+00 : f32
    %46 = vector.broadcast %cst_20 : f32 to vector<8x128xf32>
    %47 = arith.addf %46, %45 : vector<8x128xf32>
    %48 = arith.divf %46, %47 : vector<8x128xf32>
    %49 = math.tanh %43 : vector<8x128xf32>
    %50 = vector.extract_strided_slice %48 {offsets = [0, 0], sizes = [8, 32], strides = [1, 1]} : vector<8x128xf32> to vector<8x32xf32>
    %51 = vector.extract_strided_slice %48 {offsets = [0, 32], sizes = [8, 32], strides = [1, 1]} : vector<8x128xf32> to vector<8x32xf32>
    %52 = vector.extract_strided_slice %49 {offsets = [0, 64], sizes = [8, 32], strides = [1, 1]} : vector<8x128xf32> to vector<8x32xf32>
    %53 = vector.extract_strided_slice %48 {offsets = [0, 96], sizes = [8, 32], strides = [1, 1]} : vector<8x128xf32> to vector<8x32xf32>
    %54 = arith.mulf %51, %35 : vector<8x32xf32>
    %55 = arith.mulf %50, %52 : vector<8x32xf32>
    %56 = arith.addf %54, %55 : vector<8x32xf32>
    %57 = math.tanh %56 : vector<8x32xf32>
    %58 = arith.mulf %53, %57 : vector<8x32xf32>
    %c2_i32 = arith.constant 2 : i32
    %c8_i32_21 = arith.constant 8 : i32
    %59 = arith.muli %c2_i32, %c8_i32_21 : i32
    %60 = tpu.assume_multiple %59, 8 : i32
    %61 = arith.index_cast %60 : i32 to index
    %c0_22 = arith.constant 0 : index
    %62 = vector.load %arg10[%61, %c0_22] : memref<64x128xf32, #tpu.memory_space<vmem>>, vector<8x128xf32>
    %cst_23 = arith.constant dense<0.000000e+00> : vector<8x128xf32>
    %63 = tpu.matmul %58, %14, %cst_23 {dimension_numbers = #tpu.dot_dimension_numbers<[1], [0], [0], [1], [0, 0, 1, 1], [], []>} : vector<8x32xf32>, vector<32x128xf32>, vector<8x128xf32> -> vector<8x128xf32>
    %64 = arith.addf %62, %63 : vector<8x128xf32>
    %65 = arith.negf %64 : vector<8x128xf32>
    %66 = math.exp %65 : vector<8x128xf32>
    %cst_24 = arith.constant 1.000000e+00 : f32
    %67 = vector.broadcast %cst_24 : f32 to vector<8x128xf32>
    %68 = arith.addf %67, %66 : vector<8x128xf32>
    %69 = arith.divf %67, %68 : vector<8x128xf32>
    %70 = math.tanh %64 : vector<8x128xf32>
    %71 = vector.extract_strided_slice %69 {offsets = [0, 0], sizes = [8, 32], strides = [1, 1]} : vector<8x128xf32> to vector<8x32xf32>
    %72 = vector.extract_strided_slice %69 {offsets = [0, 32], sizes = [8, 32], strides = [1, 1]} : vector<8x128xf32> to vector<8x32xf32>
    %73 = vector.extract_strided_slice %70 {offsets = [0, 64], sizes = [8, 32], strides = [1, 1]} : vector<8x128xf32> to vector<8x32xf32>
    %74 = vector.extract_strided_slice %69 {offsets = [0, 96], sizes = [8, 32], strides = [1, 1]} : vector<8x128xf32> to vector<8x32xf32>
    %75 = arith.mulf %72, %56 : vector<8x32xf32>
    %76 = arith.mulf %71, %73 : vector<8x32xf32>
    %77 = arith.addf %75, %76 : vector<8x32xf32>
    %78 = math.tanh %77 : vector<8x32xf32>
    %79 = arith.mulf %74, %78 : vector<8x32xf32>
    %c3_i32 = arith.constant 3 : i32
    %c8_i32_25 = arith.constant 8 : i32
    %80 = arith.muli %c3_i32, %c8_i32_25 : i32
    %81 = tpu.assume_multiple %80, 8 : i32
    %82 = arith.index_cast %81 : i32 to index
    %c0_26 = arith.constant 0 : index
    %83 = vector.load %arg10[%82, %c0_26] : memref<64x128xf32, #tpu.memory_space<vmem>>, vector<8x128xf32>
    %cst_27 = arith.constant dense<0.000000e+00> : vector<8x128xf32>
    %84 = tpu.matmul %79, %14, %cst_27 {dimension_numbers = #tpu.dot_dimension_numbers<[1], [0], [0], [1], [0, 0, 1, 1], [], []>} : vector<8x32xf32>, vector<32x128xf32>, vector<8x128xf32> -> vector<8x128xf32>
    %85 = arith.addf %83, %84 : vector<8x128xf32>
    %86 = arith.negf %85 : vector<8x128xf32>
    %87 = math.exp %86 : vector<8x128xf32>
    %cst_28 = arith.constant 1.000000e+00 : f32
    %88 = vector.broadcast %cst_28 : f32 to vector<8x128xf32>
    %89 = arith.addf %88, %87 : vector<8x128xf32>
    %90 = arith.divf %88, %89 : vector<8x128xf32>
    %91 = math.tanh %85 : vector<8x128xf32>
    %92 = vector.extract_strided_slice %90 {offsets = [0, 0], sizes = [8, 32], strides = [1, 1]} : vector<8x128xf32> to vector<8x32xf32>
    %93 = vector.extract_strided_slice %90 {offsets = [0, 32], sizes = [8, 32], strides = [1, 1]} : vector<8x128xf32> to vector<8x32xf32>
    %94 = vector.extract_strided_slice %91 {offsets = [0, 64], sizes = [8, 32], strides = [1, 1]} : vector<8x128xf32> to vector<8x32xf32>
    %95 = vector.extract_strided_slice %90 {offsets = [0, 96], sizes = [8, 32], strides = [1, 1]} : vector<8x128xf32> to vector<8x32xf32>
    %96 = arith.mulf %93, %77 : vector<8x32xf32>
    %97 = arith.mulf %92, %94 : vector<8x32xf32>
    %98 = arith.addf %96, %97 : vector<8x32xf32>
    %99 = math.tanh %98 : vector<8x32xf32>
    %100 = arith.mulf %95, %99 : vector<8x32xf32>
    %c4_i32 = arith.constant 4 : i32
    %c8_i32_29 = arith.constant 8 : i32
    %101 = arith.muli %c4_i32, %c8_i32_29 : i32
    %102 = tpu.assume_multiple %101, 8 : i32
    %103 = arith.index_cast %102 : i32 to index
    %c0_30 = arith.constant 0 : index
    %104 = vector.load %arg10[%103, %c0_30] : memref<64x128xf32, #tpu.memory_space<vmem>>, vector<8x128xf32>
    %cst_31 = arith.constant dense<0.000000e+00> : vector<8x128xf32>
    %105 = tpu.matmul %100, %14, %cst_31 {dimension_numbers = #tpu.dot_dimension_numbers<[1], [0], [0], [1], [0, 0, 1, 1], [], []>} : vector<8x32xf32>, vector<32x128xf32>, vector<8x128xf32> -> vector<8x128xf32>
    %106 = arith.addf %104, %105 : vector<8x128xf32>
    %107 = arith.negf %106 : vector<8x128xf32>
    %108 = math.exp %107 : vector<8x128xf32>
    %cst_32 = arith.constant 1.000000e+00 : f32
    %109 = vector.broadcast %cst_32 : f32 to vector<8x128xf32>
    %110 = arith.addf %109, %108 : vector<8x128xf32>
    %111 = arith.divf %109, %110 : vector<8x128xf32>
    %112 = math.tanh %106 : vector<8x128xf32>
    %113 = vector.extract_strided_slice %111 {offsets = [0, 0], sizes = [8, 32], strides = [1, 1]} : vector<8x128xf32> to vector<8x32xf32>
    %114 = vector.extract_strided_slice %111 {offsets = [0, 32], sizes = [8, 32], strides = [1, 1]} : vector<8x128xf32> to vector<8x32xf32>
    %115 = vector.extract_strided_slice %112 {offsets = [0, 64], sizes = [8, 32], strides = [1, 1]} : vector<8x128xf32> to vector<8x32xf32>
    %116 = vector.extract_strided_slice %111 {offsets = [0, 96], sizes = [8, 32], strides = [1, 1]} : vector<8x128xf32> to vector<8x32xf32>
    %117 = arith.mulf %114, %98 : vector<8x32xf32>
    %118 = arith.mulf %113, %115 : vector<8x32xf32>
    %119 = arith.addf %117, %118 : vector<8x32xf32>
    %120 = math.tanh %119 : vector<8x32xf32>
    %121 = arith.mulf %116, %120 : vector<8x32xf32>
    %c5_i32 = arith.constant 5 : i32
    %c8_i32_33 = arith.constant 8 : i32
    %122 = arith.muli %c5_i32, %c8_i32_33 : i32
    %123 = tpu.assume_multiple %122, 8 : i32
    %124 = arith.index_cast %123 : i32 to index
    %c0_34 = arith.constant 0 : index
    %125 = vector.load %arg10[%124, %c0_34] : memref<64x128xf32, #tpu.memory_space<vmem>>, vector<8x128xf32>
    %cst_35 = arith.constant dense<0.000000e+00> : vector<8x128xf32>
    %126 = tpu.matmul %121, %14, %cst_35 {dimension_numbers = #tpu.dot_dimension_numbers<[1], [0], [0], [1], [0, 0, 1, 1], [], []>} : vector<8x32xf32>, vector<32x128xf32>, vector<8x128xf32> -> vector<8x128xf32>
    %127 = arith.addf %125, %126 : vector<8x128xf32>
    %128 = arith.negf %127 : vector<8x128xf32>
    %129 = math.exp %128 : vector<8x128xf32>
    %cst_36 = arith.constant 1.000000e+00 : f32
    %130 = vector.broadcast %cst_36 : f32 to vector<8x128xf32>
    %131 = arith.addf %130, %129 : vector<8x128xf32>
    %132 = arith.divf %130, %131 : vector<8x128xf32>
    %133 = math.tanh %127 : vector<8x128xf32>
    %134 = vector.extract_strided_slice %132 {offsets = [0, 0], sizes = [8, 32], strides = [1, 1]} : vector<8x128xf32> to vector<8x32xf32>
    %135 = vector.extract_strided_slice %132 {offsets = [0, 32], sizes = [8, 32], strides = [1, 1]} : vector<8x128xf32> to vector<8x32xf32>
    %136 = vector.extract_strided_slice %133 {offsets = [0, 64], sizes = [8, 32], strides = [1, 1]} : vector<8x128xf32> to vector<8x32xf32>
    %137 = vector.extract_strided_slice %132 {offsets = [0, 96], sizes = [8, 32], strides = [1, 1]} : vector<8x128xf32> to vector<8x32xf32>
    %138 = arith.mulf %135, %119 : vector<8x32xf32>
    %139 = arith.mulf %134, %136 : vector<8x32xf32>
    %140 = arith.addf %138, %139 : vector<8x32xf32>
    %141 = math.tanh %140 : vector<8x32xf32>
    %142 = arith.mulf %137, %141 : vector<8x32xf32>
    %c6_i32 = arith.constant 6 : i32
    %c8_i32_37 = arith.constant 8 : i32
    %143 = arith.muli %c6_i32, %c8_i32_37 : i32
    %144 = tpu.assume_multiple %143, 8 : i32
    %145 = arith.index_cast %144 : i32 to index
    %c0_38 = arith.constant 0 : index
    %146 = vector.load %arg10[%145, %c0_38] : memref<64x128xf32, #tpu.memory_space<vmem>>, vector<8x128xf32>
    %cst_39 = arith.constant dense<0.000000e+00> : vector<8x128xf32>
    %147 = tpu.matmul %142, %14, %cst_39 {dimension_numbers = #tpu.dot_dimension_numbers<[1], [0], [0], [1], [0, 0, 1, 1], [], []>} : vector<8x32xf32>, vector<32x128xf32>, vector<8x128xf32> -> vector<8x128xf32>
    %148 = arith.addf %146, %147 : vector<8x128xf32>
    %149 = arith.negf %148 : vector<8x128xf32>
    %150 = math.exp %149 : vector<8x128xf32>
    %cst_40 = arith.constant 1.000000e+00 : f32
    %151 = vector.broadcast %cst_40 : f32 to vector<8x128xf32>
    %152 = arith.addf %151, %150 : vector<8x128xf32>
    %153 = arith.divf %151, %152 : vector<8x128xf32>
    %154 = math.tanh %148 : vector<8x128xf32>
    %155 = vector.extract_strided_slice %153 {offsets = [0, 0], sizes = [8, 32], strides = [1, 1]} : vector<8x128xf32> to vector<8x32xf32>
    %156 = vector.extract_strided_slice %153 {offsets = [0, 32], sizes = [8, 32], strides = [1, 1]} : vector<8x128xf32> to vector<8x32xf32>
    %157 = vector.extract_strided_slice %154 {offsets = [0, 64], sizes = [8, 32], strides = [1, 1]} : vector<8x128xf32> to vector<8x32xf32>
    %158 = vector.extract_strided_slice %153 {offsets = [0, 96], sizes = [8, 32], strides = [1, 1]} : vector<8x128xf32> to vector<8x32xf32>
    %159 = arith.mulf %156, %140 : vector<8x32xf32>
    %160 = arith.mulf %155, %157 : vector<8x32xf32>
    %161 = arith.addf %159, %160 : vector<8x32xf32>
    %162 = math.tanh %161 : vector<8x32xf32>
    %163 = arith.mulf %158, %162 : vector<8x32xf32>
    %c7_i32 = arith.constant 7 : i32
    %c8_i32_41 = arith.constant 8 : i32
    %164 = arith.muli %c7_i32, %c8_i32_41 : i32
    %165 = tpu.assume_multiple %164, 8 : i32
    %166 = arith.index_cast %165 : i32 to index
    %c0_42 = arith.constant 0 : index
    %167 = vector.load %arg10[%166, %c0_42] : memref<64x128xf32, #tpu.memory_space<vmem>>, vector<8x128xf32>
    %cst_43 = arith.constant dense<0.000000e+00> : vector<8x128xf32>
    %168 = tpu.matmul %163, %14, %cst_43 {dimension_numbers = #tpu.dot_dimension_numbers<[1], [0], [0], [1], [0, 0, 1, 1], [], []>} : vector<8x32xf32>, vector<32x128xf32>, vector<8x128xf32> -> vector<8x128xf32>
    %169 = arith.addf %167, %168 : vector<8x128xf32>
    %170 = arith.negf %169 : vector<8x128xf32>
    %171 = math.exp %170 : vector<8x128xf32>
    %cst_44 = arith.constant 1.000000e+00 : f32
    %172 = vector.broadcast %cst_44 : f32 to vector<8x128xf32>
    %173 = arith.addf %172, %171 : vector<8x128xf32>
    %174 = arith.divf %172, %173 : vector<8x128xf32>
    %175 = math.tanh %169 : vector<8x128xf32>
    %176 = vector.extract_strided_slice %174 {offsets = [0, 0], sizes = [8, 32], strides = [1, 1]} : vector<8x128xf32> to vector<8x32xf32>
    %177 = vector.extract_strided_slice %174 {offsets = [0, 32], sizes = [8, 32], strides = [1, 1]} : vector<8x128xf32> to vector<8x32xf32>
    %178 = vector.extract_strided_slice %175 {offsets = [0, 64], sizes = [8, 32], strides = [1, 1]} : vector<8x128xf32> to vector<8x32xf32>
    %179 = vector.extract_strided_slice %174 {offsets = [0, 96], sizes = [8, 32], strides = [1, 1]} : vector<8x128xf32> to vector<8x32xf32>
    %180 = arith.mulf %177, %161 : vector<8x32xf32>
    %181 = arith.mulf %176, %178 : vector<8x32xf32>
    %182 = arith.addf %180, %181 : vector<8x32xf32>
    %183 = math.tanh %182 : vector<8x32xf32>
    %184 = arith.mulf %179, %183 : vector<8x32xf32>
    %c8_i32_45 = arith.constant 8 : i32
    %185 = vector.extract_strided_slice %7 {offsets = [56, 0], sizes = [8, 128], strides = [1, 1]} : vector<64x128xf32> to vector<8x128xf32>
    %c0_46 = arith.constant 0 : index
    %c0_47 = arith.constant 0 : index
    %186 = vector.load %arg5[%c0_46, %c0_47] : memref<128x128xf32, #tpu.memory_space<vmem>>, vector<128x128xf32>
    %cst_48 = arith.constant dense<0.000000e+00> : vector<8x128xf32>
    %187 = tpu.matmul %185, %186, %cst_48 {dimension_numbers = #tpu.dot_dimension_numbers<[1], [0], [0], [1], [0, 0, 1, 1], [], []>} : vector<8x128xf32>, vector<128x128xf32>, vector<8x128xf32> -> vector<8x128xf32>
    %c0_49 = arith.constant 0 : index
    %c0_50 = arith.constant 0 : index
    %188 = vector.load %arg6[%c0_49, %c0_50] : memref<1x128xf32, #tpu.memory_space<vmem>>, vector<1x128xf32>
    %189 = vector.broadcast %188 : vector<1x128xf32> to vector<8x128xf32>
    %190 = arith.addf %187, %189 : vector<8x128xf32>
    %191 = arith.negf %190 : vector<8x128xf32>
    %192 = math.exp %191 : vector<8x128xf32>
    %cst_51 = arith.constant 1.000000e+00 : f32
    %193 = vector.broadcast %cst_51 : f32 to vector<8x128xf32>
    %194 = arith.addf %193, %192 : vector<8x128xf32>
    %195 = arith.divf %193, %194 : vector<8x128xf32>
    %196 = math.tanh %190 : vector<8x128xf32>
    %197 = vector.extract_strided_slice %195 {offsets = [0, 0], sizes = [8, 32], strides = [1, 1]} : vector<8x128xf32> to vector<8x32xf32>
    %198 = vector.extract_strided_slice %195 {offsets = [0, 32], sizes = [8, 32], strides = [1, 1]} : vector<8x128xf32> to vector<8x32xf32>
    %199 = vector.extract_strided_slice %196 {offsets = [0, 64], sizes = [8, 32], strides = [1, 1]} : vector<8x128xf32> to vector<8x32xf32>
    %200 = vector.extract_strided_slice %195 {offsets = [0, 96], sizes = [8, 32], strides = [1, 1]} : vector<8x128xf32> to vector<8x32xf32>
    %201 = arith.mulf %198, %16 : vector<8x32xf32>
    %202 = arith.mulf %197, %199 : vector<8x32xf32>
    %203 = arith.addf %201, %202 : vector<8x32xf32>
    %204 = math.tanh %203 : vector<8x32xf32>
    %205 = arith.mulf %200, %204 : vector<8x32xf32>
    %c0_52 = arith.constant 0 : index
    %c0_53 = arith.constant 0 : index
    %206 = vector.load %arg7[%c0_52, %c0_53] : memref<64x128xf32, #tpu.memory_space<vmem>>, vector<32x128xf32>
    %cst_54 = arith.constant dense<0.000000e+00> : vector<8x128xf32>
    %207 = tpu.matmul %184, %206, %cst_54 {dimension_numbers = #tpu.dot_dimension_numbers<[1], [0], [0], [1], [0, 0, 1, 1], [], []>} : vector<8x32xf32>, vector<32x128xf32>, vector<8x128xf32> -> vector<8x128xf32>
    %c32 = arith.constant 32 : index
    %c0_55 = arith.constant 0 : index
    %208 = vector.load %arg7[%c32, %c0_55] : memref<64x128xf32, #tpu.memory_space<vmem>>, vector<32x128xf32>
    %cst_56 = arith.constant dense<0.000000e+00> : vector<8x128xf32>
    %209 = tpu.matmul %205, %208, %cst_56 {dimension_numbers = #tpu.dot_dimension_numbers<[1], [0], [0], [1], [0, 0, 1, 1], [], []>} : vector<8x32xf32>, vector<32x128xf32>, vector<8x128xf32> -> vector<8x128xf32>
    %210 = arith.addf %207, %209 : vector<8x128xf32>
    %c0_57 = arith.constant 0 : index
    %c0_58 = arith.constant 0 : index
    %211 = vector.load %arg8[%c0_57, %c0_58] : memref<1x128xf32, #tpu.memory_space<vmem>>, vector<1x128xf32>
    %212 = vector.broadcast %211 : vector<1x128xf32> to vector<8x128xf32>
    %213 = arith.addf %210, %212 : vector<8x128xf32>
    %c0_59 = arith.constant 0 : index
    %c0_60 = arith.constant 0 : index
    %214 = vector.load %arg9[%c0_59, %c0_60] : memref<8x128xf32, #tpu.memory_space<vmem>>, vector<8x128xf32>
    tpu.vector_store %arg9[%c0_59, %c0_60], %213 {strides = array<i32>} : memref<8x128xf32, #tpu.memory_space<vmem>>, vector<8x128xf32>,
    return
  }
}

</mosaic_0001>

<bundles_post_ra>
// kernel: textrnn_forward.1
= control target key start
LH: loop header
LB: loop body
LE: loop exit
PB: predicated region body
PF: predicated region fallthrough
CT: control target
= control target key end

     0   :  { %14 = vsyncpa [#allocation4], 0  ;;  %s2724_s0 = inlined_call_operand.vmem [shape: s32[64,1], index: 0, kind: input, shape index: {}]   ;;  %s2725_s1 = inlined_call_operand.hbm [shape: f32[128,128], index: 1, kind: input, shape index: {}]   ;;  %s2726_s2 = inlined_call_operand.vmem [shape: f32[128,128], index: 2, kind: input, shape index: {}]   ;;  %s2727_s3 = inlined_call_operand.hbm [shape: f32[32,128], index: 3, kind: input, shape index: {}]   ;;  %s2728_s4 = inlined_call_operand.hbm [shape: f32[1,128], index: 4, kind: input, shape index: {}]   ;;  %s2729_s5 = inlined_call_operand.hbm [shape: f32[128,128], index: 5, kind: input, shape index: {}]   ;;  %s2730_s6 = inlined_call_operand.hbm [shape: f32[1,128], index: 6, kind: input, shape index: {}]   ;;  %s2731_s7 = inlined_call_operand.hbm [shape: f32[64,128], index: 7, kind: input, shape index: {}]   ;;  %s2732_s8 = inlined_call_operand.hbm [shape: f32[1,128], index: 8, kind: input, shape index: {}]   ;;  %s2733_s9 = inlined_call_operand.vmem [shape: f32[8,128], index: 9, kind: output, shape index: {}]  }
   0x1   :  { %15 = vsyncpa [#allocation6], 0 }
   0x2   :  { %16 = vsyncpa [#allocation9], 0 }
   0x3   :  { %17 = vsyncpa [#allocation12], 0  ;;  %s2331_s30 = smov [#allocation5]   ;;  %s2332_s11 = smov [#allocation8]  }
   0x4   :  { %s39_s10 = sshll.u32 %s2331_s30, 4  ;;  %s61_s12 = sshll.u32 %s2332_s11, 4  ;;  %s40_s10 = int_to_ptr.vmem [resolvable:$true] %s39_s10  ;;  %s2397_s12 = int_to_ptr.vmem [resolvable:$true] %s61_s12 }
   0x5   :  { %s2169_s15 = scalar_lea.hbm %s2727_s3, 512 }
   0x6   :  { %p2170_p0 = scmp.ne.s32.totalorder %s2727_s3, %s2169_s15  ;;  %p2173_p1 = scmp.lt.u32.totalorder %s2169_s15, %s2727_s3 }
   0x8   :  { %p2175_p2 = pnand %p2173_p1, %p2170_p0 }
   0xa   :  { %2178 = shalt.err (!%p2175_p2)
}
   0xb   :  { %s2179_s20 = scalar_lea.vmem %s40_s10, 512  ;;  %p2184_p4 = scmp.lt.s32.totalorder %s40_s10, %s40_s10 }
   0xc   :  { %p2180_p3 = scmp.ne.s32.totalorder %s40_s10, %s2179_s20  ;;  %p2185_p5 = scmp.lt.s32.totalorder %s2179_s20, %s2179_s20 }
   0xe   :  { %p2186_p6 = por %p2185_p5, %p2184_p4 }
  0x10   :  { %p2187_p7 = pnand %p2186_p6, %p2180_p3 }
  0x12   :  { %2190 = shalt.err (!%p2187_p7)
}
  0x13   :  { %s2333_s21 = smov 128   ;;  %s2334_s22 = smov 8  }
  0x14   :  { %45 = dma.hbm_to_vmem [thread:$0]  %s2727_s3, 512, %s40_s10, [#allocation6], %s2333_s21, %s2333_s21, %s2334_s22  }
  0x15   :  { %s2191_s27 = scalar_lea.hbm %s2729_s5, 2048 }
  0x16   :  { %p2192_p8 = scmp.ne.s32.totalorder %s2729_s5, %s2191_s27  ;;  %p2195_p9 = scmp.lt.u32.totalorder %s2191_s27, %s2729_s5 }
  0x18   :  { %p2197_p10 = pnand %p2195_p9, %p2192_p8 }
  0x1a   :  { %2200 = shalt.err (!%p2197_p10)
}
  0x1b   :  { %s2201_s13 = scalar_lea.vmem %s2397_s12, 2048  ;;  %p2206_p12 = scmp.lt.s32.totalorder %s2397_s12, %s2397_s12 }
  0x1c   :  { %p2202_p11 = scmp.ne.s32.totalorder %s2397_s12, %s2201_s13  ;;  %p2207_p13 = scmp.lt.s32.totalorder %s2201_s13, %s2201_s13 }
  0x1e   :  { %p2208_p0 = por %p2207_p13, %p2206_p12 }
  0x20   :  { %p2209_p1 = pnand %p2208_p0, %p2202_p11 }
  0x22   :  { %2212 = shalt.err (!%p2209_p1)
}
  0x23   :  { %67 = dma.hbm_to_vmem [thread:$0]  %s2729_s5, 2048, %s2397_s12, [#allocation9], %s2333_s21, %s2333_s21, %s2334_s22  }
  0x24   :  { %s2335_s14 = smov [#allocation11]   ;;  %s2336_s16 = smov [#allocation3]  }
  0x25   :  { %s83_s15 = sshll.u32 %s2335_s14, 4  ;;  %s25_s17 = sshll.u32 %s2336_s16, 4  ;;  %s84_s15 = int_to_ptr.vmem [resolvable:$true] %s83_s15  ;;  %s2434_s17 = int_to_ptr.vmem [resolvable:$true] %s25_s17 }
  0x26   :  { %s2213_s20 = scalar_lea.hbm %s2731_s7, 1024 }
  0x27   :  { %p2214_p2 = scmp.ne.s32.totalorder %s2731_s7, %s2213_s20  ;;  %p2217_p3 = scmp.lt.u32.totalorder %s2213_s20, %s2731_s7 }
  0x29   :  { %p2219_p4 = pnand %p2217_p3, %p2214_p2 }
  0x2b   :  { %2222 = shalt.err (!%p2219_p4)
}
  0x2c   :  { %s2223_s5 = scalar_lea.vmem %s84_s15, 1024  ;;  %p2228_p6 = scmp.lt.s32.totalorder %s84_s15, %s84_s15 }
  0x2d   :  { %p2224_p5 = scmp.ne.s32.totalorder %s84_s15, %s2223_s5  ;;  %p2229_p7 = scmp.lt.s32.totalorder %s2223_s5, %s2223_s5 }
  0x2f   :  { %p2230_p8 = por %p2229_p7, %p2228_p6 }
  0x31   :  { %p2231_p9 = pnand %p2230_p8, %p2224_p5 }
  0x33   :  { %2234 = shalt.err (!%p2231_p9)
}
  0x34   :  { %89 = dma.hbm_to_vmem [thread:$0]  %s2731_s7, 1024, %s84_s15, [#allocation12], %s2333_s21, %s2333_s21, %s2334_s22  }
  0x35   :  { %s2235_s30 = scalar_lea.hbm %s2725_s1, 2048 }
  0x36   :  { %p2236_p10 = scmp.ne.s32.totalorder %s2725_s1, %s2235_s30  ;;  %p2239_p11 = scmp.lt.u32.totalorder %s2235_s30, %s2725_s1 }
  0x38   :  { %p2241_p12 = pnand %p2239_p11, %p2236_p10 }
  0x3a   :  { %2244 = shalt.err (!%p2241_p12)
}
  0x3b   :  { %s2245_s14 = scalar_lea.vmem %s2434_s17, 2048  ;;  %p2250_p0 = scmp.lt.s32.totalorder %s2434_s17, %s2434_s17 }
  0x3c   :  { %p2246_p13 = scmp.ne.s32.totalorder %s2434_s17, %s2245_s14  ;;  %p2251_p1 = scmp.lt.s32.totalorder %s2245_s14, %s2245_s14 }
  0x3e   :  { %p2252_p2 = por %p2251_p1, %p2250_p0 }
  0x40   :  { %p2253_p3 = pnand %p2252_p2, %p2246_p13 }
  0x42   :  { %2256 = shalt.err (!%p2253_p3)
}
  0x43   :  { %31 = dma.hbm_to_vmem [thread:$0]  %s2725_s1, 2048, %s2434_s17, [#allocation4], %s2333_s21, %s2333_s21, %s2334_s22  }
  0x44   :  { %s2337_s16 = smov [#allocation7]   ;;  %s2338_s19 = smov [#allocation10]  }
  0x45   :  { %s52_s18 = sshll.u32 %s2337_s16, 4  ;;  %s74_s20 = sshll.u32 %s2338_s19, 4  ;;  %s53_s18 = int_to_ptr.vmem [resolvable:$true] %s52_s18  ;;  %s75_s20 = int_to_ptr.vmem [resolvable:$true] %s74_s20 }
  0x46   :  { %s2257_s25 = scalar_lea.hbm %s2728_s4, 16 }
  0x47   :  { %p2258_p4 = scmp.ne.s32.totalorder %s2728_s4, %s2257_s25  ;;  %p2261_p5 = scmp.lt.u32.totalorder %s2257_s25, %s2728_s4 }
  0x49   :  { %p2263_p6 = pnand %p2261_p5, %p2258_p4 }
  0x4b   :  { %2266 = shalt.err (!%p2263_p6)
}
  0x4c   :  { %s2267_s1 = scalar_lea.vmem %s53_s18, 16  ;;  %s2271_s21 = scalar_lea.vmem %s53_s18, 32 }
  0x4d   :  { %p2268_p7 = scmp.ne.s32.totalorder %s53_s18, %s2267_s1  ;;  %p2272_p8 = scmp.lt.s32.totalorder %s53_s18, %s53_s18 }
  0x4e   :  { %p2273_p9 = scmp.lt.s32.totalorder %s2271_s21, %s2267_s1 }
  0x50   :  { %p2274_p10 = por %p2273_p9, %p2272_p8 }
  0x52   :  { %p2275_p11 = pnand %p2274_p10, %p2268_p7 }
  0x54   :  { %2278 = shalt.err (!%p2275_p11)
}
  0x55   :  { %55 = dma.hbm_to_vmem [thread:$0]  %s2728_s4, 16, %s53_s18, [#allocation6]  }
  0x56   :  { %s2279_s30 = scalar_lea.hbm %s2730_s6, 16 }
  0x57   :  { %p2280_p12 = scmp.ne.s32.totalorder %s2730_s6, %s2279_s30  ;;  %p2283_p13 = scmp.lt.u32.totalorder %s2279_s30, %s2730_s6 }
  0x59   :  { %p2285_p0 = pnand %p2283_p13, %p2280_p12 }
  0x5b   :  { %2288 = shalt.err (!%p2285_p0)
}
  0x5c   :  { %s2289_s14 = scalar_lea.vmem %s75_s20, 16  ;;  %s2293_s7 = scalar_lea.vmem %s75_s20, 32 }
  0x5d   :  { %p2290_p1 = scmp.ne.s32.totalorder %s75_s20, %s2289_s14  ;;  %p2294_p2 = scmp.lt.s32.totalorder %s75_s20, %s75_s20 }
  0x5e   :  { %p2295_p3 = scmp.lt.s32.totalorder %s2293_s7, %s2289_s14 }
  0x60   :  { %p2296_p4 = por %p2295_p3, %p2294_p2 }
  0x62   :  { %p2297_p5 = pnand %p2296_p4, %p2290_p1 }
  0x64   :  { %2300 = shalt.err (!%p2297_p5)
}
  0x65   :  { %77 = dma.hbm_to_vmem [thread:$0]  %s2730_s6, 16, %s75_s20, [#allocation9]  }
  0x66   :  { %s2339_s16 = smov [#allocation13]   ;;  %s2301_s24 = scalar_lea.hbm %s2732_s8, 16 }
  0x67   :  { %s96_s18 = sshll.u32 %s2339_s16, 4  ;;  %p2302_p6 = scmp.ne.s32.totalorder %s2732_s8, %s2301_s24  ;;  %s97_s18 = int_to_ptr.vmem [resolvable:$true] %s96_s18 }
  0x68   :  { %p2305_p7 = scmp.lt.u32.totalorder %s2301_s24, %s2732_s8 }
  0x6a   :  { %p2307_p8 = pnand %p2305_p7, %p2302_p6 }
  0x6c   :  { %2310 = shalt.err (!%p2307_p8)
}
  0x6d   :  { %s2311_s27 = scalar_lea.vmem %s97_s18, 16  ;;  %s2315_s6 = scalar_lea.vmem %s97_s18, 32 }
  0x6e   :  { %p2312_p9 = scmp.ne.s32.totalorder %s97_s18, %s2311_s27  ;;  %p2316_p10 = scmp.lt.s32.totalorder %s97_s18, %s97_s18 }
  0x6f   :  { %p2317_p11 = scmp.lt.s32.totalorder %s2315_s6, %s2311_s27 }
  0x71   :  { %p2318_p12 = por %p2317_p11, %p2316_p10 }
  0x73   :  { %p2319_p13 = pnand %p2318_p12, %p2312_p9 }
  0x75   :  { %2322 = shalt.err (!%p2319_p13)
}
  0x76   :  { %99 = dma.hbm_to_vmem [thread:$0]  %s2732_s8, 16, %s97_s18, [#allocation12]  }
  0x77   :  { %2323 = dma.done.wait [#allocation4], 2048  }
  0x78   :  { %2324 = vsyncadd [#allocation4], 4294965248 }
  0x79   :  { %2325 = dma.done.wait [#allocation6], 528  }
  0x7a   :  { %2326 = vsyncadd [#allocation6], 4294966768 }
  0x7b   :  { %2327 = dma.done.wait [#allocation9], 2064  }
  0x7c   :  { %2328 = vsyncadd [#allocation9], 4294965232 }
  0x7d   :  { %2329 = dma.done.wait [#allocation12], 1040  }
  0x7e   :  { %2330 = vsyncadd [#allocation12], 4294966256  ;;  %v2340_v0 = vmov 0   ;;  %v123_v1 = vld [vmem:[%s2724_s0 + $0x10] sm:$0xff]  ;;  %v121_v2 = vld [vmem:[%s2724_s0] sm:$0xff]  ;;  %v129_v57 = vlaneseq  ;;  %v2341_v61 = vmov 1.0  }
  0x7f   :  { %2096 = vset.pattern.permute.xlu1 %v2340_v0  ;;  %2095 = vset.pattern.permute.xlu0 %v2340_v0  ;;  %v124_v3 = vld [vmem:[%s2724_s0 + $0x18] sm:$0xff]  ;;  %v122_v4 = vld [vmem:[%s2724_s0 + $0x8] sm:$0xff]  ;;  %v179_v5 = vld [vmem:[#allocation3] sm:$0xff]  ;;  %vm2343_vm8 = vmmov 0   ;;  %s2346_s24 = smov 32   ;;  %vm441_vm9 = vcmask 261120  }
  0x80   :  { %138 = vperm.xlu1 %2096, %v123_v1   ;;  %132 = vperm.xlu0 %2095, %v121_v2   ;;  %v180_v6 = vld [vmem:[#allocation3 + $0x8] sm:$0xff]  ;;  %v181_v7 = vld [vmem:[#allocation3 + $0x10] sm:$0xff]  ;;  %v182_v8 = vld [vmem:[#allocation3 + $0x18] sm:$0xff]  ;;  %v130_v58 = vand.u32 127, %v129_v57 }
  0x81   :  { %v1931_v9 = vpack.c.bf16 %v180_v6, %v179_v5  ;;  %v1935_v10 = vpack.c.bf16 %v182_v8, %v181_v7  ;;  %v183_v11 = vld [vmem:[#allocation3 + $0x20] sm:$0xff]  ;;  %v184_v12 = vld [vmem:[#allocation3 + $0x28] sm:$0xff]  ;;  %v185_v16 = vld [vmem:[#allocation3 + $0x30] sm:$0xff] }
  0x82   :  { %v126_v13 = vld [vmem:[%s2724_s0 + $0x28] sm:$0xff]  ;;  %v125_v14 = vld [vmem:[%s2724_s0 + $0x20] sm:$0xff]  ;;  %v1939_v15 = vpack.c.bf16 %v184_v12, %v183_v11  ;;  %v186_v17 = vld [vmem:[#allocation3 + $0x38] sm:$0xff]  ;;  %v2344_v11 = vmov 0.0  }
  0x83   :  { %1932 = vmatprep.subr.bf16.mxu0 %v1931_v9  ;;  %v128_v18 = vld [vmem:[%s2724_s0 + $0x38] sm:$0xff]  ;;  %v127_v19 = vld [vmem:[%s2724_s0 + $0x30] sm:$0xff]  ;;  %v1943_v20 = vpack.c.bf16 %v186_v17, %v185_v16  ;;  %v187_v21 = vld [vmem:[#allocation3 + $0x40] sm:$0xff] }
  0x84   :  { %141 = vperm.xlu1 %2096, %v124_v3   ;;  %135 = vperm.xlu0 %2095, %v122_v4   ;;  %v188_v22 = vld [vmem:[#allocation3 + $0x48] sm:$0xff]  ;;  %v189_v24 = vld [vmem:[#allocation3 + $0x50] sm:$0xff]  ;;  %v190_v25 = vld [vmem:[#allocation3 + $0x58] sm:$0xff]  ;;  %v2342_v4 = vmov 0.0|0.0  }
  0x85   :  { %1934 = vmatpush3.bf16.msra.mxu0 %v1931_v9  ;;  %v1947_v23 = vpack.c.bf16 %v188_v22, %v187_v21  ;;  %v300_v26 = vld [vmem:[%s2726_s2] sm:$0xff]  ;;  %v301_v27 = vld [vmem:[%s2726_s2 + $0x8] sm:$0xff]  ;;  %v302_v28 = vld [vmem:[%s2726_s2 + $0x10] sm:$0xff]  ;;  %v1951_v31 = vpack.c.bf16 %v190_v25, %v189_v24 }
  0x86   :  { %1936 = vmatprep.subr.bf16.mxu0 %v1935_v10  ;;  %v1963_v29 = vpack.c.bf16 %v301_v27, %v300_v26  ;;  %v303_v30 = vld [vmem:[%s2726_s2 + $0x18] sm:$0xff]  ;;  %v304_v33 = vld [vmem:[%s2726_s2 + $0x20] sm:$0xff]  ;;  %v305_v34 = vld [vmem:[%s2726_s2 + $0x28] sm:$0xff] }
  0x87   :  { %v1967_v32 = vpack.c.bf16 %v303_v30, %v302_v28  ;;  %v191_v35 = vld [vmem:[#allocation3 + $0x60] sm:$0xff]  ;;  %v192_v36 = vld [vmem:[#allocation3 + $0x68] sm:$0xff]  ;;  %v1971_v37 = vpack.c.bf16 %v305_v34, %v304_v33  ;;  %v306_v39 = vld [vmem:[%s2726_s2 + $0x30] sm:$0xff] }
  0x88   :  { %147 = vperm.xlu1 %2096, %v126_v13   ;;  %144 = vperm.xlu0 %2095, %v125_v14   ;;  %v1955_v38 = vpack.c.bf16 %v192_v36, %v191_v35  ;;  %v307_v40 = vld [vmem:[%s2726_s2 + $0x38] sm:$0xff]  ;;  %v193_v41 = vld [vmem:[#allocation3 + $0x70] sm:$0xff]  ;;  %v308_v45 = vld [vmem:[%s2726_s2 + $0x40] sm:$0xff] }
  0x89   :  { %1938 = vmatpush3.bf16.msra.mxu0 %v1935_v10  ;;  %1964 = vmatprep.subr.bf16.mxu1 %v1963_v29  ;;  %v194_v42 = vld [vmem:[#allocation3 + $0x78] sm:$0xff]  ;;  %v1975_v43 = vpack.c.bf16 %v307_v40, %v306_v39  ;;  %v309_v46 = vld [vmem:[%s2726_s2 + $0x48] sm:$0xff]  ;;  %v310_v48 = vld [vmem:[%s2726_s2 + $0x50] sm:$0xff] }
  0x8a   :  { %1940 = vmatprep.subr.bf16.mxu0 %v1939_v15  ;;  %1966 = vmatpush3.bf16.msra.mxu1 %v1963_v29  ;;  %v1959_v44 = vpack.c.bf16 %v194_v42, %v193_v41  ;;  %v1979_v47 = vpack.c.bf16 %v309_v46, %v308_v45  ;;  %v311_v49 = vld [vmem:[%s2726_s2 + $0x58] sm:$0xff]  ;;  %v312_v51 = vld [vmem:[%s2726_s2 + $0x60] sm:$0xff]  ;;  %v313_v52 = vld [vmem:[%s2726_s2 + $0x68] sm:$0xff] }
  0x8b   :  { %1968 = vmatprep.subr.bf16.mxu1 %v1967_v32  ;;  %v1983_v50 = vpack.c.bf16 %v311_v49, %v310_v48  ;;  %v1987_v53 = vpack.c.bf16 %v313_v52, %v312_v51  ;;  %v314_v54 = vld [vmem:[%s2726_s2 + $0x70] sm:$0xff]  ;;  %v315_v55 = vld [vmem:[%s2726_s2 + $0x78] sm:$0xff]  ;;  %v436_v5 = vld [vmem:[#allocation5] sm:$0xff]  ;;  %s2345_s2 = smov 64  }
  0x8c   :  { %153 = vperm.xlu1 %2096, %v128_v18   ;;  %150 = vperm.xlu0 %2095, %v127_v19   ;;  %v1991_v56 = vpack.c.bf16 %v315_v55, %v314_v54  ;;  %v437_v6 = vld [vmem:[#allocation5 + $0x8] sm:$0xff]  ;;  %v438_v8 = vld [vmem:[#allocation5 + $0x10] sm:$0xff]  ;;  %v439_v9 = vld [vmem:[#allocation5 + $0x18] sm:$0xff] }
  0x8d   :  { %1942 = vmatpush3.bf16.msra.mxu0 %v1939_v15  ;;  %v2581_v7 = vpack.c.bf16 %v437_v6, %v436_v5  ;;  %v2585_v10 = vpack.c.bf16 %v439_v9, %v438_v8 }
  0x8e   :  { %1944 = vmatprep.subr.bf16.mxu0 %v1943_v20  ;;  %1970 = vmatpush3.bf16.msra.mxu1 %v1967_v32 }
  0x8f   :  { %1972 = vmatprep.subr.bf16.mxu1 %v1971_v37 }
  0x91   :  { %1946 = vmatpush3.bf16.msra.mxu0 %v1943_v20  ;;  %v1562_v20 = vld [vmem:[#allocation7] ss:$0 sm:$0xff] }
  0x92   :  { %1948 = vmatprep.subr.bf16.mxu0 %v1947_v23  ;;  %1974 = vmatpush3.bf16.msra.mxu1 %v1971_v37 }
  0x93   :  { %1976 = vmatprep.subr.bf16.mxu1 %v1975_v43 }
  0x95   :  { %1950 = vmatpush3.bf16.msra.mxu0 %v1947_v23 }
  0x96   :  { %1952 = vmatprep.subr.bf16.mxu0 %v1951_v31  ;;  %1978 = vmatpush3.bf16.msra.mxu1 %v1975_v43 }
  0x97   :  { %1980 = vmatprep.subr.bf16.mxu1 %v1979_v47 }
  0x99   :  { %1954 = vmatpush3.bf16.msra.mxu0 %v1951_v31 }
  0x9a   :  { %1956 = vmatprep.subr.bf16.mxu0 %v1955_v38  ;;  %1982 = vmatpush3.bf16.msra.mxu1 %v1979_v47 }
  0x9b   :  { %1984 = vmatprep.subr.bf16.mxu1 %v1983_v50 }
  0x9d   :  { %1958 = vmatpush3.bf16.msra.mxu0 %v1955_v38 }
  0x9e   :  { %1960 = vmatprep.subr.bf16.mxu0 %v1959_v44  ;;  %1986 = vmatpush3.bf16.msra.mxu1 %v1983_v50 }
  0x9f   :  { %1988 = vmatprep.subr.bf16.mxu1 %v1987_v53 }
  0xa1   :  { %1962 = vmatpush3.bf16.msra.mxu0 %v1959_v44 }
  0xa2   :  { %1990 = vmatpush3.bf16.msra.mxu1 %v1987_v53  ;;  %2007 = vmatprep.subr.bf16.mxu0 %v2342_v4 }
  0xa3   :  { %1992 = vmatprep.subr.bf16.mxu1 %v1991_v56 }
  0xa6   :  { %1994 = vmatpush3.bf16.msra.mxu1 %v1991_v56 }
  0xa7   :  { %1995 = vmatprep.subr.bf16.mxu1 %v2342_v4 }
  0xff   :  { %v139_v59 = vpop.permute.xlu1 %138  ;;  %v133_v60 = vpop.permute.xlu0 %132 }
 0x100   :  { %vm155_vm0 = vcmp.eq.s32.totalorder %v130_v58, %v133_v60  ;;  %vm157_vm1 = vcmp.eq.s32.totalorder %v130_v58, %v139_v59 }
 0x101   :  { %1730 = vmatprep.mubr.msk.f32.mxu0 %vm155_vm0, %v2341_v61 }
 0x103   :  { %v142_v62 = vpop.permute.xlu1 %141  ;;  %v136_v63 = vpop.permute.xlu0 %135 }
 0x104   :  { %vm156_vm2 = vcmp.eq.s32.totalorder %v130_v58, %v136_v63  ;;  %vm158_vm3 = vcmp.eq.s32.totalorder %v130_v58, %v142_v62 }
 0x105   :  { %1731 = vmatmul.mubr.msk.f32.vlgmr.msra.gmra.mrb[0].mxu0 %vm156_vm2, %v2341_v61 }
 0x106   :  { %1733 = vmatprep.mubr.msk.f32.mxu0 %vm157_vm1, %v2341_v61  ;;  %2009 = vmatpush3.bf16.msra.mxu0 %v2581_v7 }
 0x107   :  { %v148_v0 = vpop.permute.xlu1 %147  ;;  %v145_v1 = vpop.permute.xlu0 %144  ;;  %2010 = vmatprep.subr.bf16.mxu0 %v2342_v4 }
 0x108   :  { %vm159_vm4 = vcmp.eq.s32.totalorder %v130_v58, %v145_v1  ;;  %vm160_vm5 = vcmp.eq.s32.totalorder %v130_v58, %v148_v0 }
 0x109   :  { %1734 = vmatmul.mubr.msk.f32.gmra.mrb[2].mxu0 %vm158_vm3, %v2341_v61 }
 0x10a   :  { %1736 = vmatprep.mubr.msk.f32.mxu0 %vm159_vm4, %v2341_v61  ;;  %2012 = vmatpush3.bf16.msra.mxu0 %v2585_v10 }
 0x10b   :  { %v151_v2 = vpop.permute.xlu0 %150  ;;  %v154_v3 = vpop.permute.xlu1 %153  ;;  %2019 = vmatprep.subr.bf16.mxu0 %v2342_v4 }
 0x10c   :  { %vm161_vm6 = vcmp.eq.s32.totalorder %v130_v58, %v151_v2  ;;  %vm162_vm7 = vcmp.eq.s32.totalorder %v130_v58, %v154_v3 }
 0x10d   :  { %1737 = vmatmul.mubr.msk.f32.gmra.mrb[4].mxu0 %vm160_vm5, %v2341_v61 }
 0x10e   :  { %1739 = vmatprep.mubr.msk.f32.mxu0 %vm161_vm6, %v2341_v61 }
 0x111   :  { %1740 = vmatmul.mubr.msk.f32.gmra.mrb[6].mxu0 %vm162_vm7, %v2341_v61 }
 0x112   :  { %1816 = vmatprep.mubr.msk.f32.mxu0 %vm2343_vm8, %v2344_v11 }
 0x1d8   :  { %v1732_v12 = vpop.f32.mrb[0].mxu0 }
 0x1d9   :  { %v261_v13 = vpop.f32.mrb[1].mxu0 }
 0x1da   :  { %1774 = vmatprep.mubr.f32.mxu1 %v261_v13 }
 0x1db   :  { %1775 = vmatmul.mubr.f32.vlgmr.msra.gmra.mrb[0].mxu1 %v1732_v12 }
 0x1dc   :  { %1997 = vmatpush3.bf16.msra.mxu1 %v2581_v7  ;;  %v1735_v14 = vpop.f32.mrb[2].mxu0 }
 0x1dd   :  { %v271_v15 = vpop.f32.mrb[3].mxu0  ;;  %1998 = vmatprep.subr.bf16.mxu1 %v2342_v4 }
 0x1de   :  { %1777 = vmatprep.mubr.f32.mxu1 %v271_v15 }
 0x1df   :  { %1778 = vmatmul.mubr.f32.gmra.mrb[2].mxu1 %v1735_v14 }
 0x1e0   :  { %v1738_v16 = vpop.f32.mrb[4].mxu0  ;;  %2000 = vmatpush3.bf16.msra.mxu1 %v2585_v10 }
 0x1e1   :  { %v281_v17 = vpop.f32.mrb[5].mxu0  ;;  %2001 = vmatprep.subr.bf16.mxu1 %v2342_v4 }
 0x1e2   :  { %1780 = vmatprep.mubr.f32.mxu1 %v281_v17 }
 0x1e3   :  { %1781 = vmatmul.mubr.f32.gmra.mrb[4].mxu1 %v1738_v16 }
 0x1e4   :  { %v2595_v18 = vpop.f32.mrb[6].mxu0 }
 0x1e5   :  { %v291_v19 = vpop.f32.mrb[7].mxu0 }
 0x1e6   :  { %1783 = vmatprep.mubr.f32.mxu1 %v291_v19 }
 0x1e7   :  { %1784 = vmatmul.mubr.f32.gmra.mrb[6].mxu1 %v2595_v18 }
 0x1e8   :  { %1794 = vmatprep.mubr.msk.f32.mxu1 %vm2343_vm8, %v2344_v11 }
 0x1eb   :  { %1795 = vmatmul.mubr.f32.vlgmr.msra.gmra.mrb[8].mxu1 %v2344_v11 }
 0x1ec   :  { %2003 = vmatpush3.bf16.msra.mxu1 %v2581_v7  ;;  %1805 = vmatprep.mubr.msk.f32.mxu1 %vm2343_vm8, %v2344_v11 }
 0x1ed   :  { %2004 = vmatprep.subr.bf16.mxu1 %v2342_v4 }
 0x1f0   :  { %2006 = vmatpush3.bf16.msra.mxu1 %v2585_v10 }
 0x1f1   :  { %2013 = vmatprep.subr.bf16.mxu1 %v2342_v4 }
 0x2ae   :  { %v1776_v21 = vpop.f32.mrb[0].mxu1 }
 0x2af   :  { %v395_v22 = vadd.f32 %v1776_v21, %v1562_v20  ;;  %v389_v23 = vpop.f32.mrb[1].mxu1 }
 0x2b0   :  { %v390_v36 = vadd.f32 %v1562_v20, %v389_v23 }
 0x2b2   :  { %v1779_v24 = vpop.f32.mrb[2].mxu1 }
 0x2b3   :  { %v2607_v25 = vadd.f32 %v1779_v24, %v1562_v20  ;;  %v399_v26 = vpop.f32.mrb[3].mxu1 }
 0x2b4   :  { %v2609_v27 = vadd.f32 %v1562_v20, %v399_v26 }
 0x2b6   :  { %v1782_v28 = vpop.f32.mrb[4].mxu1 }
 0x2b7   :  { %v2611_v29 = vadd.f32 %v1782_v28, %v1562_v20  ;;  %v409_v30 = vpop.f32.mrb[5].mxu1 }
 0x2b8   :  { %v2613_v31 = vadd.f32 %v1562_v20, %v409_v30 }
 0x2ba   :  { %v1785_v32 = vpop.f32.mrb[6].mxu1 }
 0x2bb   :  { %v2615_v33 = vadd.f32 %v1785_v32, %v1562_v20  ;;  %v419_v34 = vpop.f32.mrb[7].mxu1 }
 0x2bc   :  { %v2617_v35 = vadd.f32 %v1562_v20, %v419_v34 }
 0x2be   :  { %v511_v37 = vpop.f32.mrb[8].mxu1 }
 0x2bf   :  { %v515_v38 = vadd.f32 %v511_v37, %v390_v36  ;;  %v1796_v39 = vpop.f32.mrb[9].mxu1 }
 0x2c1   :  { %2097 = vtanh.f32 %v515_v38  ;;  %v1563_v41 = vmul.f32 -1.442695, %v515_v38 }
 0x2c3   :  { %2099 = vpow2.f32 %v1563_v41 }
 0x2cb   :  { %v2098_v40 = vpop.eup %2097 }
 0x2cc   :  { %525 = vrot.lane.b32.xlu0 %v2098_v40, %s2345_s2 }
 0x2cd   :  { %v2100_v42 = vpop.eup %2099 }
 0x2ce   :  { %v519_v43 = vadd.f32 1.0, %v2100_v42 }
 0x2d0   :  { %2101 = vrcp.f32 %v519_v43 }
 0x2da   :  { %v2102_v44 = vpop.eup %2101 }
 0x2db   :  { %v523_v47 = vmul.f32 0.0, %v2102_v44 }
 0x33e   :  { %v526_v45 = vpop.permute.xlu0 %525 }
 0x33f   :  { %v528_v46 = vmul.f32 %v2102_v44, %v526_v45 }
 0x341   :  { %530 = vrot.lane.b32.xlu1 %v528_v46, %s2346_s24 }
 0x3b3   :  { %v531_v48 = vpop.permute.xlu1 %530 }
 0x3b4   :  { %v533_v49 = vadd.f32 %v531_v48, %v523_v47 }
 0x3b6   :  { %2103 = vtanh.f32 %v533_v49 }
 0x3c0   :  { %v2104_v50 = vpop.eup %2103 }
 0x3c1   :  { %536 = vrot.lane.b32.xlu0 %v2104_v50, %s2345_s2 }
 0x433   :  { %v537_v51 = vpop.permute.xlu0 %536 }
 0x434   :  { %v539_v52 = vmul.f32 %v2102_v44, %v537_v51 }
 0x436   :  { %543 = vrot.lane.b32.xlu1 %v539_v52, %s2346_s24 }
 0x4a8   :  { %v544_v53 = vpop.permute.xlu1 %543 }
 0x4a9   :  { %1806 = vmatmul.mubr.msk.f32.vlgmr.msra.gmra.mrb[10].mxu1 %vm441_vm9, %v544_v53 }
 0x4aa   :  { %2015 = vmatpush3.bf16.msra.mxu1 %v2581_v7  ;;  %1827 = vmatprep.mubr.msk.f32.mxu1 %vm2343_vm8, %v2344_v11 }
 0x4ab   :  { %2016 = vmatprep.subr.bf16.mxu1 %v2342_v4 }
 0x4ae   :  { %2018 = vmatpush3.bf16.msra.mxu1 %v2585_v10 }
 0x4af   :  { %2025 = vmatprep.subr.bf16.mxu1 %v2342_v4 }
 0x57c   :  { %v613_v54 = vpop.f32.mrb[10].mxu1 }
 0x57d   :  { %v617_v55 = vadd.f32 %v613_v54, %v395_v22  ;;  %v1807_v56 = vpop.f32.mrb[11].mxu1 }
 0x57f   :  { %2105 = vtanh.f32 %v617_v55  ;;  %v1565_v58 = vmul.f32 -1.442695, %v617_v55 }
 0x581   :  { %2107 = vpow2.f32 %v1565_v58 }
 0x589   :  { %v2106_v57 = vpop.eup %2105 }
 0x58a   :  { %627 = vrot.lane.b32.xlu0 %v2106_v57, %s2345_s2 }
 0x58b   :  { %v2108_v59 = vpop.eup %2107 }
 0x58c   :  { %v621_v60 = vadd.f32 1.0, %v2108_v59 }
 0x58e   :  { %2109 = vrcp.f32 %v621_v60 }
 0x598   :  { %v2110_v61 = vpop.eup %2109 }
 0x599   :  { %v625_v0 = vmul.f32 %v2110_v61, %v533_v49 }
 0x5fc   :  { %v628_v62 = vpop.permute.xlu0 %627 }
 0x5fd   :  { %v630_v63 = vmul.f32 %v2110_v61, %v628_v62 }
 0x5ff   :  { %632 = vrot.lane.b32.xlu1 %v630_v63, %s2346_s24 }
 0x671   :  { %v633_v1 = vpop.permute.xlu1 %632 }
 0x672   :  { %v635_v2 = vadd.f32 %v633_v1, %v625_v0 }
 0x674   :  { %2111 = vtanh.f32 %v635_v2 }
 0x67e   :  { %v2112_v3 = vpop.eup %2111 }
 0x67f   :  { %638 = vrot.lane.b32.xlu0 %v2112_v3, %s2345_s2 }
 0x6f1   :  { %v639_v5 = vpop.permute.xlu0 %638 }
 0x6f2   :  { %v641_v6 = vmul.f32 %v2110_v61, %v639_v5 }
 0x6f4   :  { %645 = vrot.lane.b32.xlu1 %v641_v6, %s2346_s24 }
 0x766   :  { %v646_v8 = vpop.permute.xlu1 %645 }
 0x767   :  { %1817 = vmatmul.mubr.msk.f32.vlgmr.msra.gmra.mrb[8].mxu0 %vm441_vm9, %v646_v8 }
 0x768   :  { %2021 = vmatpush3.bf16.msra.mxu0 %v2581_v7  ;;  %1838 = vmatprep.mubr.msk.f32.mxu0 %vm2343_vm8, %v2344_v11 }
 0x769   :  { %2022 = vmatprep.subr.bf16.mxu0 %v2342_v4 }
 0x76c   :  { %2024 = vmatpush3.bf16.msra.mxu0 %v2585_v10 }
 0x76d   :  { %2031 = vmatprep.subr.bf16.mxu0 %v2342_v4 }
 0x83a   :  { %v715_v9 = vpop.f32.mrb[8].mxu0 }
 0x83b   :  { %v719_v12 = vadd.f32 %v715_v9, %v2609_v27  ;;  %v1818_v13 = vpop.f32.mrb[9].mxu0 }
 0x83d   :  { %2113 = vtanh.f32 %v719_v12  ;;  %v1567_v15 = vmul.f32 -1.442695, %v719_v12 }
 0x83f   :  { %2115 = vpow2.f32 %v1567_v15 }
 0x847   :  { %v2114_v14 = vpop.eup %2113 }
 0x848   :  { %729 = vrot.lane.b32.xlu0 %v2114_v14, %s2345_s2 }
 0x849   :  { %v2116_v16 = vpop.eup %2115 }
 0x84a   :  { %v723_v17 = vadd.f32 1.0, %v2116_v16 }
 0x84c   :  { %2117 = vrcp.f32 %v723_v17 }
 0x856   :  { %v2118_v19 = vpop.eup %2117 }
 0x857   :  { %v727_v22 = vmul.f32 %v2118_v19, %v635_v2 }
 0x8ba   :  { %v730_v20 = vpop.permute.xlu0 %729 }
 0x8bb   :  { %v732_v21 = vmul.f32 %v2118_v19, %v730_v20  ;;  %v1254_v20 = vld [vmem:[#allocation8] sm:$0xff] }
 0x8bd   :  { %734 = vrot.lane.b32.xlu1 %v732_v21, %s2346_s24  ;;  %v1255_v21 = vld [vmem:[#allocation8 + $0x8] sm:$0xff] }
 0x92f   :  { %v735_v23 = vpop.permute.xlu1 %734 }
 0x930   :  { %v737_v24 = vadd.f32 %v735_v23, %v727_v22  ;;  %v2044_v22 = vpack.c.bf16 %v1255_v21, %v1254_v20  ;;  %v1256_v23 = vld [vmem:[#allocation8 + $0x10] sm:$0xff]  ;;  %v1378_v20 = vld [vmem:[#allocation11 + $0x38] sm:$0xff] }
 0x932   :  { %2119 = vtanh.f32 %v737_v24 }
 0x93c   :  { %v2120_v26 = vpop.eup %2119 }
 0x93d   :  { %740 = vrot.lane.b32.xlu0 %v2120_v26, %s2345_s2 }
 0x9af   :  { %v741_v27 = vpop.permute.xlu0 %740 }
 0x9b0   :  { %v743_v28 = vmul.f32 %v2118_v19, %v741_v27 }
 0x9b2   :  { %747 = vrot.lane.b32.xlu1 %v743_v28, %s2346_s24  ;;  %v1258_v28 = vld [vmem:[#allocation8 + $0x20] sm:$0xff] }
 0xa24   :  { %v748_v30 = vpop.permute.xlu1 %747 }
 0xa25   :  { %1828 = vmatmul.mubr.msk.f32.vlgmr.msra.gmra.mrb[12].mxu1 %vm441_vm9, %v748_v30  ;;  %v1259_v30 = vld [vmem:[#allocation8 + $0x28] sm:$0xff] }
 0xa26   :  { %2027 = vmatpush3.bf16.msra.mxu1 %v2581_v7  ;;  %1849 = vmatprep.mubr.msk.f32.mxu1 %vm2343_vm8, %v2344_v11 }
 0xa27   :  { %2028 = vmatprep.subr.bf16.mxu1 %v2342_v4 }
 0xa2a   :  { %2030 = vmatpush3.bf16.msra.mxu1 %v2585_v10 }
 0xa2b   :  { %2037 = vmatprep.subr.bf16.mxu1 %v2342_v4 }
 0xaf8   :  { %v817_v32 = vpop.f32.mrb[12].mxu1 }
 0xaf9   :  { %v821_v34 = vadd.f32 %v817_v32, %v2607_v25  ;;  %v1829_v36 = vpop.f32.mrb[13].mxu1  ;;  %v2050_v32 = vpack.c.bf16 %v1259_v30, %v1258_v28 }
 0xafa   :  { %v1261_v36 = vld [vmem:[#allocation8 + $0x38] sm:$0xff] }
 0xafb   :  { %2121 = vtanh.f32 %v821_v34  ;;  %v1569_v38 = vmul.f32 -1.442695, %v821_v34  ;;  %v1260_v34 = vld [vmem:[#allocation8 + $0x30] sm:$0xff] }
 0xafd   :  { %2123 = vpow2.f32 %v1569_v38  ;;  %v1262_v38 = vld [vmem:[#allocation8 + $0x40] sm:$0xff] }
 0xb05   :  { %v2122_v37 = vpop.eup %2121 }
 0xb06   :  { %831 = vrot.lane.b32.xlu0 %v2122_v37, %s2345_s2  ;;  %v2053_v37 = vpack.c.bf16 %v1261_v36, %v1260_v34 }
 0xb07   :  { %v2124_v39 = vpop.eup %2123 }
 0xb08   :  { %v825_v40 = vadd.f32 1.0, %v2124_v39  ;;  %v1263_v39 = vld [vmem:[#allocation8 + $0x48] sm:$0xff] }
 0xb0a   :  { %2125 = vrcp.f32 %v825_v40  ;;  %v2056_v40 = vpack.c.bf16 %v1263_v39, %v1262_v38 }
 0xb14   :  { %v2126_v41 = vpop.eup %2125 }
 0xb15   :  { %v829_v44 = vmul.f32 %v2126_v41, %v737_v24  ;;  %v1257_v24 = vld [vmem:[#allocation8 + $0x18] sm:$0xff] }
 0xb16   :  { %v2047_v27 = vpack.c.bf16 %v1257_v24, %v1256_v23 }
 0xb78   :  { %v832_v42 = vpop.permute.xlu0 %831 }
 0xb79   :  { %v834_v43 = vmul.f32 %v2126_v41, %v832_v42  ;;  %v1265_v42 = vld [vmem:[#allocation8 + $0x58] sm:$0xff] }
 0xb7b   :  { %836 = vrot.lane.b32.xlu1 %v834_v43, %s2346_s24 }
 0xbed   :  { %v837_v45 = vpop.permute.xlu1 %836 }
 0xbee   :  { %v839_v46 = vadd.f32 %v837_v45, %v829_v44  ;;  %v1266_v44 = vld [vmem:[#allocation8 + $0x60] sm:$0xff]  ;;  %v1267_v45 = vld [vmem:[#allocation8 + $0x68] sm:$0xff] }
 0xbf0   :  { %2127 = vtanh.f32 %v839_v46 }
 0xbfa   :  { %v2128_v25 = vpop.eup %2127 }
 0xbfb   :  { %842 = vrot.lane.b32.xlu0 %v2128_v25, %s2345_s2  ;;  %v1268_v25 = vld [vmem:[#allocation8 + $0x70] sm:$0xff] }
 0xc6d   :  { %v843_v47 = vpop.permute.xlu0 %842 }
 0xc6e   :  { %v845_v48 = vmul.f32 %v2126_v41, %v843_v47  ;;  %v1264_v41 = vld [vmem:[#allocation8 + $0x50] sm:$0xff]  ;;  %v1269_v47 = vld [vmem:[#allocation8 + $0x78] sm:$0xff] }
 0xc6f   :  { %v2059_v43 = vpack.c.bf16 %v1265_v42, %v1264_v41  ;;  %v1371_v42 = vld [vmem:[#allocation11] sm:$0xff] }
 0xc70   :  { %849 = vrot.lane.b32.xlu1 %v845_v48, %s2346_s24  ;;  %v2065_v48 = vpack.c.bf16 %v1269_v47, %v1268_v25 }
 0xce2   :  { %v850_v49 = vpop.permute.xlu1 %849 }
 0xce3   :  { %1839 = vmatmul.mubr.msk.f32.vlgmr.msra.gmra.mrb[10].mxu0 %vm441_vm9, %v850_v49 }
 0xce4   :  { %2033 = vmatpush3.bf16.msra.mxu0 %v2581_v7  ;;  %1860 = vmatprep.mubr.msk.f32.mxu0 %vm2343_vm8, %v2344_v11 }
 0xce5   :  { %2034 = vmatprep.subr.bf16.mxu0 %v2342_v4 }
 0xce8   :  { %2036 = vmatpush3.bf16.msra.mxu0 %v2585_v10 }
 0xce9   :  { %2043 = vmatprep.subr.bf16.mxu0 %v2342_v4 }
 0xdb6   :  { %v919_v50 = vpop.f32.mrb[10].mxu0 }
 0xdb7   :  { %v923_v51 = vadd.f32 %v919_v50, %v2613_v31  ;;  %v1840_v52 = vpop.f32.mrb[11].mxu0 }
 0xdb9   :  { %2129 = vtanh.f32 %v923_v51  ;;  %v1571_v54 = vmul.f32 -1.442695, %v923_v51 }
 0xdbb   :  { %2131 = vpow2.f32 %v1571_v54 }
 0xdc3   :  { %v2130_v53 = vpop.eup %2129 }
 0xdc4   :  { %933 = vrot.lane.b32.xlu0 %v2130_v53, %s2345_s2 }
 0xdc5   :  { %v2132_v55 = vpop.eup %2131 }
 0xdc6   :  { %v927_v56 = vadd.f32 1.0, %v2132_v55 }
 0xdc8   :  { %2133 = vrcp.f32 %v927_v56 }
 0xdd2   :  { %v2134_v57 = vpop.eup %2133 }
 0xdd3   :  { %v931_v60 = vmul.f32 %v2134_v57, %v839_v46  ;;  %v2062_v46 = vpack.c.bf16 %v1267_v45, %v1266_v44  ;;  %v1373_v44 = vld [vmem:[#allocation11 + $0x10] sm:$0xff] }
 0xe36   :  { %v934_v58 = vpop.permute.xlu0 %933 }
 0xe37   :  { %v936_v59 = vmul.f32 %v2134_v57, %v934_v58 }
 0xe39   :  { %938 = vrot.lane.b32.xlu1 %v936_v59, %s2346_s24 }
 0xeab   :  { %v939_v61 = vpop.permute.xlu1 %938 }
 0xeac   :  { %v941_v62 = vadd.f32 %v939_v61, %v931_v60 }
 0xeae   :  { %2135 = vtanh.f32 %v941_v62 }
 0xeb8   :  { %v2136_v31 = vpop.eup %2135 }
 0xeb9   :  { %944 = vrot.lane.b32.xlu0 %v2136_v31, %s2345_s2 }
 0xf2b   :  { %v945_v63 = vpop.permute.xlu0 %944 }
 0xf2c   :  { %v947_v0 = vmul.f32 %v2134_v57, %v945_v63 }
 0xf2e   :  { %951 = vrot.lane.b32.xlu1 %v947_v0, %s2346_s24 }
 0xfa0   :  { %v952_v1 = vpop.permute.xlu1 %951 }
 0xfa1   :  { %1850 = vmatmul.mubr.msk.f32.vlgmr.msra.gmra.mrb[14].mxu1 %vm441_vm9, %v952_v1 }
 0xfa2   :  { %2039 = vmatpush3.bf16.msra.mxu1 %v2581_v7  ;;  %1871 = vmatprep.mubr.msk.f32.mxu1 %vm2343_vm8, %v2344_v11 }
 0xfa3   :  { %2040 = vmatprep.subr.bf16.mxu1 %v2342_v4 }
 0xfa6   :  { %2042 = vmatpush3.bf16.msra.mxu1 %v2585_v10 }
 0xfa7   :  { %2067 = vmatprep.subr.bf16.mxu1 %v2342_v4 }
0x1074   :  { %v1021_v2 = vpop.f32.mrb[14].mxu1 }
0x1075   :  { %v1025_v3 = vadd.f32 %v1021_v2, %v2611_v29  ;;  %v1851_v5 = vpop.f32.mrb[15].mxu1 }
0x1077   :  { %2137 = vtanh.f32 %v1025_v3  ;;  %v1573_v8 = vmul.f32 -1.442695, %v1025_v3 }
0x1079   :  { %2139 = vpow2.f32 %v1573_v8 }
0x1081   :  { %v2138_v6 = vpop.eup %2137 }
0x1082   :  { %1035 = vrot.lane.b32.xlu0 %v2138_v6, %s2345_s2 }
0x1083   :  { %v2140_v7 = vpop.eup %2139 }
0x1084   :  { %v1029_v9 = vadd.f32 1.0, %v2140_v7 }
0x1086   :  { %2141 = vrcp.f32 %v1029_v9 }
0x1090   :  { %v2142_v12 = vpop.eup %2141 }
0x1091   :  { %v1033_v10 = vmul.f32 %v2142_v12, %v941_v62 }
0x10f4   :  { %v1036_v13 = vpop.permute.xlu0 %1035 }
0x10f5   :  { %v1038_v14 = vmul.f32 %v2142_v12, %v1036_v13 }
0x10f7   :  { %1040 = vrot.lane.b32.xlu1 %v1038_v14, %s2346_s24 }
0x1169   :  { %v1041_v15 = vpop.permute.xlu1 %1040 }
0x116a   :  { %v2680_v16 = vadd.f32 %v1041_v15, %v1033_v10 }
0x116c   :  { %2143 = vtanh.f32 %v2680_v16 }
0x1176   :  { %v2144_v29 = vpop.eup %2143 }
0x1177   :  { %1046 = vrot.lane.b32.xlu0 %v2144_v29, %s2345_s2  ;;  %v1376_v29 = vld [vmem:[#allocation11 + $0x28] sm:$0xff] }
0x11e9   :  { %v1047_v17 = vpop.permute.xlu0 %1046 }
0x11ea   :  { %v1049_v19 = vmul.f32 %v2142_v12, %v1047_v17  ;;  %v1377_v17 = vld [vmem:[#allocation11 + $0x30] sm:$0xff] }
0x11eb   :  { %v2071_v21 = vpack.c.bf16 %v1378_v20, %v1377_v17 }
0x11ec   :  { %1053 = vrot.lane.b32.xlu1 %v1049_v19, %s2346_s24 }
0x125e   :  { %v1054_v26 = vpop.permute.xlu1 %1053 }
0x125f   :  { %1861 = vmatmul.mubr.msk.f32.vlgmr.msra.gmra.mrb[12].mxu0 %vm441_vm9, %v1054_v26 }
0x1260   :  { %2045 = vmatpush3.bf16.msra.mxu0 %v2044_v22  ;;  %1906 = vmatprep.mubr.msk.f32.mxu0 %vm2343_vm8, %v2344_v11 }
0x1261   :  { %2046 = vmatprep.subr.bf16.mxu0 %v2342_v4 }
0x1264   :  { %2048 = vmatpush3.bf16.msra.mxu0 %v2047_v27 }
0x1265   :  { %2049 = vmatprep.subr.bf16.mxu0 %v2342_v4 }
0x1268   :  { %2051 = vmatpush3.bf16.msra.mxu0 %v2050_v32 }
0x1269   :  { %2052 = vmatprep.subr.bf16.mxu0 %v2342_v4 }
0x126c   :  { %2054 = vmatpush3.bf16.msra.mxu0 %v2053_v37 }
0x126d   :  { %2055 = vmatprep.subr.bf16.mxu0 %v2342_v4 }
0x1270   :  { %2057 = vmatpush3.bf16.msra.mxu0 %v2056_v40 }
0x1271   :  { %2058 = vmatprep.subr.bf16.mxu0 %v2342_v4 }
0x1274   :  { %2060 = vmatpush3.bf16.msra.mxu0 %v2059_v43  ;;  %v1372_v43 = vld [vmem:[#allocation11 + $0x8] sm:$0xff] }
0x1275   :  { %2061 = vmatprep.subr.bf16.mxu0 %v2342_v4 }
0x1278   :  { %2063 = vmatpush3.bf16.msra.mxu0 %v2062_v46  ;;  %v2074_v46 = vpack.c.bf16 %v1372_v43, %v1371_v42 }
0x1279   :  { %2064 = vmatprep.subr.bf16.mxu0 %v2342_v4 }
0x127c   :  { %2066 = vmatpush3.bf16.msra.mxu0 %v2065_v48 }
0x127f   :  { %1907 = vmatmul.mubr.f32.vlgmr.msra.gmra.mrb[14].mxu0 %v2595_v18 }
0x1332   :  { %v1123_v49 = vpop.f32.mrb[12].mxu0 }
0x1333   :  { %v1127_v50 = vadd.f32 %v1123_v49, %v2617_v35  ;;  %v1862_v51 = vpop.f32.mrb[13].mxu0  ;;  %v1578_v35 = vld [vmem:[#allocation10] ss:$0 sm:$0xff] }
0x1335   :  { %2145 = vtanh.f32 %v1127_v50  ;;  %v1575_v55 = vmul.f32 -1.442695, %v1127_v50 }
0x1337   :  { %2147 = vpow2.f32 %v1575_v55 }
0x133f   :  { %v2146_v52 = vpop.eup %2145 }
0x1340   :  { %1137 = vrot.lane.b32.xlu0 %v2146_v52, %s2345_s2 }
0x1341   :  { %v2148_v56 = vpop.eup %2147 }
0x1342   :  { %v1131_v57 = vadd.f32 1.0, %v2148_v56 }
0x1344   :  { %2149 = vrcp.f32 %v1131_v57 }
0x134e   :  { %v2150_v58 = vpop.eup %2149 }
0x134f   :  { %v1135_v18 = vmul.f32 %v2150_v58, %v2680_v16  ;;  %v1375_v16 = vld [vmem:[#allocation11 + $0x20] sm:$0xff] }
0x1350   :  { %v2068_v19 = vpack.c.bf16 %v1376_v29, %v1375_v16 }
0x1352   :  { %v1343_v53 = vpop.f32.mrb[14].mxu0 }
0x1353   :  { %v1908_v54 = vpop.f32.mrb[15].mxu0  ;;  %v1344_v31 = vadd.f32 %v1578_v35, %v1343_v53  ;;  %v1582_v53 = vld [vmem:[#allocation13] ss:$0 sm:$0xff] }
0x1355   :  { %v1579_v1 = vmul.f32 -1.442695, %v1344_v31 }
0x13b2   :  { %v1138_v59 = vpop.permute.xlu0 %1137 }
0x13b3   :  { %v1140_v60 = vmul.f32 %v2150_v58, %v1138_v59 }
0x13b5   :  { %1142 = vrot.lane.b32.xlu1 %v1140_v60, %s2346_s24 }
0x1427   :  { %v1143_v61 = vpop.permute.xlu1 %1142 }
0x1428   :  { %v1145_v62 = vadd.f32 %v1143_v61, %v1135_v18 }
0x142a   :  { %2151 = vtanh.f32 %v1145_v62 }
0x142b   :  { %2153 = vtanh.f32 %v1344_v31 }
0x142c   :  { %2155 = vpow2.f32 %v1579_v1 }
0x1434   :  { %v2152_v63 = vpop.eup %2151 }
0x1435   :  { %1148 = vrot.lane.b32.xlu0 %v2152_v63, %s2345_s2  ;;  %v2154_v0 = vpop.eup %2153 }
0x1436   :  { %v2156_v2 = vpop.eup %2155 }
0x1437   :  { %v1350_v3 = vadd.f32 1.0, %v2156_v2 }
0x1439   :  { %1356 = vrot.lane.b32.xlu0 %v2154_v0, %s2345_s2  ;;  %2157 = vrcp.f32 %v1350_v3 }
0x1443   :  { %v2158_v8 = vpop.eup %2157 }
0x1444   :  { %v1354_v13 = vmul.f32 0.0, %v2158_v8 }
0x14a7   :  { %v1149_v5 = vpop.permute.xlu0 %1148 }
0x14a8   :  { %v1151_v6 = vmul.f32 %v2150_v58, %v1149_v5 }
0x14aa   :  { %1155 = vrot.lane.b32.xlu1 %v1151_v6, %s2346_s24 }
0x14ab   :  { %v1357_v7 = vpop.permute.xlu0 %1356 }
0x14ac   :  { %v1359_v9 = vmul.f32 %v2158_v8, %v1357_v7 }
0x14ae   :  { %1361 = vrot.lane.b32.xlu0 %v1359_v9, %s2346_s24 }
0x151c   :  { %v1156_v12 = vpop.permute.xlu1 %1155 }
0x151d   :  { %1872 = vmatmul.mubr.msk.f32.vlgmr.msra.gmra.mrb[16].mxu1 %vm441_vm9, %v1156_v12 }
0x151e   :  { %1917 = vmatprep.mubr.msk.f32.mxu1 %vm2343_vm8, %v2344_v11  ;;  %2069 = vmatpush3.bf16.msra.mxu1 %v2068_v19 }
0x151f   :  { %2070 = vmatprep.subr.bf16.mxu1 %v2342_v4 }
0x1520   :  { %v1362_v14 = vpop.permute.xlu0 %1361 }
0x1521   :  { %v1364_v10 = vadd.f32 %v1362_v14, %v1354_v13 }
0x1522   :  { %2072 = vmatpush3.bf16.msra.mxu1 %v2071_v21 }
0x1523   :  { %2159 = vtanh.f32 %v1364_v10  ;;  %2073 = vmatprep.subr.bf16.mxu1 %v2342_v4 }
0x152d   :  { %v2160_v15 = vpop.eup %2159 }
0x152e   :  { %1367 = vrot.lane.b32.xlu0 %v2160_v15, %s2345_s2 }
0x15a0   :  { %v1368_v22 = vpop.permute.xlu0 %1367 }
0x15a1   :  { %v1370_v23 = vmul.f32 %v2158_v8, %v1368_v22 }
0x15a3   :  { %1380 = vrot.lane.b32.xlu0 %v1370_v23, %s2346_s24 }
0x15f0   :  { %v1225_v24 = vpop.f32.mrb[16].mxu1 }
0x15f1   :  { %v1229_v26 = vadd.f32 %v1225_v24, %v2615_v33  ;;  %v1873_v27 = vpop.f32.mrb[17].mxu1 }
0x15f3   :  { %2161 = vtanh.f32 %v1229_v26  ;;  %v1577_v32 = vmul.f32 -1.442695, %v1229_v26 }
0x15f5   :  { %2163 = vpow2.f32 %v1577_v32 }
0x15fd   :  { %v2162_v28 = vpop.eup %2161 }
0x15fe   :  { %1239 = vrot.lane.b32.xlu1 %v2162_v28, %s2345_s2 }
0x15ff   :  { %v2164_v34 = vpop.eup %2163 }
0x1600   :  { %v1233_v36 = vadd.f32 1.0, %v2164_v34 }
0x1602   :  { %2165 = vrcp.f32 %v1233_v36 }
0x160c   :  { %v2166_v37 = vpop.eup %2165 }
0x160d   :  { %v1237_v33 = vmul.f32 %v2166_v37, %v1145_v62 }
0x1615   :  { %v1381_v30 = vpop.permute.xlu0 %1380 }
0x1616   :  { %1918 = vmatmul.mubr.msk.f32.vlgmr.msra.gmra.mrb[18].mxu1 %vm441_vm9, %v1381_v30 }
0x1617   :  { %1928 = vmatprep.mubr.msk.f32.mxu1 %vm2343_vm8, %v2344_v11  ;;  %v1374_v11 = vld [vmem:[#allocation11 + $0x18] sm:$0xff]  ;;  %2075 = vmatpush3.bf16.msra.mxu1 %v2074_v46 }
0x1618   :  { %v2077_v47 = vpack.c.bf16 %v1374_v11, %v1373_v44  ;;  %2076 = vmatprep.subr.bf16.mxu1 %v2342_v4 }
0x161b   :  { %2078 = vmatpush3.bf16.msra.mxu1 %v2077_v47 }
0x1670   :  { %v1240_v38 = vpop.permute.xlu1 %1239 }
0x1671   :  { %v1242_v39 = vmul.f32 %v2166_v37, %v1240_v38 }
0x1673   :  { %1244 = vrot.lane.b32.xlu1 %v1242_v39, %s2346_s24 }
0x16e5   :  { %v1245_v40 = vpop.permute.xlu1 %1244 }
0x16e6   :  { %v1247_v41 = vadd.f32 %v1245_v40, %v1237_v33 }
0x16e8   :  { %2167 = vtanh.f32 %v1247_v41 }
0x16e9   :  { %v1450_v45 = vpop.f32.mrb[18].mxu1 }
0x16ea   :  { %v1919_v25 = vpop.f32.mrb[19].mxu1 }
0x16f2   :  { %v2168_v48 = vpop.eup %2167 }
0x16f3   :  { %1250 = vrot.lane.b32.xlu1 %v2168_v48, %s2345_s2 }
0x1765   :  { %v1251_v49 = vpop.permute.xlu1 %1250 }
0x1766   :  { %v1253_v50 = vmul.f32 %v2166_v37, %v1251_v49 }
0x1768   :  { %1455 = vrot.lane.b32.xlu1 %v1253_v50, %s2346_s24 }
0x17da   :  { %v1456_v51 = vpop.permute.xlu1 %1455 }
0x17db   :  { %1929 = vmatmul.mubr.msk.f32.vlgmr.msra.gmra.mrb[20].mxu1 %vm441_vm9, %v1456_v51 }
0x18ae   :  { %v1525_v52 = vpop.f32.mrb[20].mxu1 }
0x18af   :  { %v1526_v54 = vadd.f32 %v1525_v52, %v1450_v45  ;;  %v1930_v55 = vpop.f32.mrb[21].mxu1 }
0x18b1   :  { %v1536_v56 = vadd.f32 %v1582_v53, %v1526_v54 }
0x18b3   :  { %1537 = vst [vmem:[%s2733_s9] sm:$0xff] %v1536_v56 }
0x18b4   :  { %1542 = vsyncpa [#allocation4], 1 }
0x18b5   :  { %1543 = vsyncpa [#allocation6], 1 }
0x18b6   :  { %1544 = vsyncpa [#allocation9], 1 }
0x18b7   :  { %1545 = vsyncpa [#allocation12], 1 }

</bundles_post_ra>
